<compile_context>
chip_gen: v6e
topology: v6e:2x2x1
jax: 0.10.0
libtpu: 0.0.40
codegen_flags: <defaults>
</compile_context>

<pallas_src>
import functools

import jax
import jax.numpy as jnp
from jax.experimental import pallas as pl
from jax.experimental.pallas import tpu as pltpu


# ---------------------------------------------------------------------------
# Recurrent LSTM kernel: one grid step == `time_chunk` timesteps of one batch chunk.
# ---------------------------------------------------------------------------
def _lstm_recurrent_kernel(gx_ref, w_hbm_ref, y_ref, hn_ref, cn_ref,
                           w_scr, h_scr, c_scr, w_sem,
                           *, t_total, time_chunk, unroll):
    """grid = (B // Bc [parallel], T_pad // Tc [arbitrary]).

    gx_ref   : (Tc, Bc, 4H) bf16  precomputed x @ W_ih^T + bias, streamed per chunk
    w_hbm_ref: (H, 4H)  bf16      weight-dropped W_hh^T, left in HBM (memory_space=ANY)
    w_scr    : (H, 4H)  bf16 VMEM single resident copy (no double buffering)
    h_scr/c_scr: (Bc, H) f32 VMEM recurrent carries
    """
    t_idx = pl.program_id(1)

    @pl.when(t_idx == 0)
    def _prologue():
        # One explicit DMA of the (already weight-dropped) recurrent weight into a single
        # VMEM scratch: exactly one resident buffer instead of a double-buffered input.
        cp = pltpu.make_async_copy(w_hbm_ref, w_scr, w_sem)
        cp.start()
        cp.wait()
        h_scr[...] = jnp.zeros_like(h_scr)
        c_scr[...] = jnp.zeros_like(c_scr)

    H = h_scr.shape[-1]
    w_hh_t = w_scr[...]                      # (H, 4H) bf16, resident across the time sweep
    t0 = t_idx * time_chunk

    def step(s, carry):
        h, c = carry                         # f32 carries
        # Recurrent matmul with bf16 MXU inputs, f32 accumulation; gate math stays f32.
        gates = gx_ref[s].astype(jnp.float32) + jnp.dot(
            h.astype(jnp.bfloat16), w_hh_t, preferred_element_type=jnp.float32)
        # Gate order (i, f, g, o).
        # TODO(synk): pad H to a multiple of 128 at real sizes so these slices are
        # lane-aligned (free) and y stores are full 128-lane vst.
        i_g = jax.nn.sigmoid(gates[:, 0 * H:1 * H])
        f_g = jax.nn.sigmoid(gates[:, 1 * H:2 * H])
        g_g = jnp.tanh(gates[:, 2 * H:3 * H])
        o_g = jax.nn.sigmoid(gates[:, 3 * H:4 * H])
        c_new = f_g * c + i_g * g_g
        h_new = o_g * jnp.tanh(c_new)
        y_ref[s] = h_new.astype(y_ref.dtype)
        # Padded tail steps (global t >= t_total) must not advance the carries
        # (arithmetic blend avoids scalar-i1 broadcasts in Mosaic).
        keep = ((t0 + s) < t_total).astype(jnp.float32)
        h = keep * h_new + (1.0 - keep) * h
        c = keep * c_new + (1.0 - keep) * c
        return h, c

    h_fin, c_fin = jax.lax.fori_loop(
        0, time_chunk, step, (h_scr[...], c_scr[...]), unroll=unroll)
    h_scr[...] = h_fin
    c_scr[...] = c_fin

    @pl.when(t_idx == pl.num_programs(1) - 1)
    def _epilogue():
        hn_ref[...] = h_fin.astype(hn_ref.dtype)
        cn_ref[...] = c_fin.astype(cn_ref.dtype)


@functools.partial(jax.jit, static_argnames=("time_chunk", "batch_chunk"))
def weight_drop_lstm(x, w_ih, w_hh_raw, mask, b_ih, b_hh, *,
                     time_chunk=32, batch_chunk=None):
    """x: (T, B, I); mask: (4H, 1) in {0, 1/(1-p)}. Returns (y (T,B,H), h_n (B,H), c_n (B,H))."""
    T, B, I = x.shape
    H4, H = w_hh_raw.shape

    # --- WeightDrop: variational per-row mask applied ONCE (same mask for all timesteps).
    # A single fused XLA broadcast-mul + bf16 cast on the pre-transposed weight; per the perf
    # review a standalone Pallas launch + f32 HBM round trip for this tiny op is a net loss.
    mask_row = jnp.reshape(mask.astype(jnp.float32), (1, H4))               # (1, 4H)
    w_hh_masked_t = (jnp.transpose(w_hh_raw).astype(jnp.float32)
                     * mask_row).astype(jnp.bfloat16)                        # (H, 4H)

    # --- Hoisted input projection: one big MXU matmul over all T*B rows (bf16 in, f32 acc).
    bias = (b_ih + b_hh).astype(jnp.float32)
    gates_x = jax.lax.dot_general(
        x.reshape(T * B, I).astype(jnp.bfloat16),
        jnp.transpose(w_ih).astype(jnp.bfloat16),
        (((1,), (0,)), ((), ())), preferred_element_type=jnp.float32)
    gates_x = (gates_x + bias[None, :]).reshape(T, B, H4)
    # Stream pre-activations in bf16 (halves the dominant HBM stream + its VMEM double
    # buffer). Deliberate rounding of the f32 pre-activations; carries stay f32 in-kernel.
    gates_x = gates_x.astype(jnp.bfloat16)

    # --- Time chunking via cdiv + padding (no Tc=1 degenerate case for prime/awkward T).
    Tc = max(1, min(int(time_chunk), T))
    n_tc = pl.cdiv(T, Tc)
    T_pad = n_tc * Tc
    if T_pad != T:
        gates_x = jnp.pad(gates_x, ((0, T_pad - T), (0, 0), (0, 0)))

    # --- Optional batch chunking: leading 'parallel' grid axis (megacore on v7x).
    Bc = B if batch_chunk is None else int(batch_chunk)
    assert B % Bc == 0, "batch_chunk must divide the batch"
    n_bc = B // Bc

    out_dtype = x.dtype
    itemsize = jnp.dtype(out_dtype).itemsize

    # --- Explicit VMEM budget (default scoped limit: 16 MiB v5e, 32 MiB v6e/v7x).
    need = (2 * Tc * Bc * H4 * 2            # gx chunk, bf16, double buffered
            + 2 * Tc * Bc * H * itemsize    # y chunk, double buffered
            + H * H4 * 2                    # resident masked W_hh^T (single bf16 buffer)
            + 2 * Bc * H * 4)               # f32 carries
    vmem_limit = int(min(max(4 * need, 32 * 1024 * 1024), 64 * 1024 * 1024))

    kernel = functools.partial(
        _lstm_recurrent_kernel,
        t_total=T, time_chunk=Tc, unroll=min(8, Tc))

    grid_spec = pltpu.PrefetchScalarGridSpec(
        num_scalar_prefetch=0,
        grid=(n_bc, n_tc),
        in_specs=[
            # Precomputed gate pre-activations, chunked over (batch, time).
            # TODO(synk): on v6e consider pipeline_mode=pl.Buffered(3) here if the per-chunk
            # DMA is still exposed behind the Tc-step compute.
            pl.BlockSpec((Tc, Bc, H4), lambda b, t: (t, b, 0)),
            # Masked W_hh^T stays in HBM; one manual DMA lands it in a single VMEM scratch.
            pl.BlockSpec(memory_space=pl.ANY),
        ],
        out_specs=[
            pl.BlockSpec((Tc, Bc, H), lambda b, t: (t, b, 0)),   # y chunk
            pl.BlockSpec((Bc, H), lambda b, t: (b, 0)),          # h_n (written at last t)
            pl.BlockSpec((Bc, H), lambda b, t: (b, 0)),          # c_n (written at last t)
        ],
        scratch_shapes=[
            pltpu.VMEM((H, H4), jnp.bfloat16),   # resident masked W_hh^T (single buffer)
            pltpu.VMEM((Bc, H), jnp.float32),    # h carry
            pltpu.VMEM((Bc, H), jnp.float32),    # c carry
            pltpu.SemaphoreType.DMA(()),         # weight-load DMA completion
        ],
    )

    y_pad, h_n, c_n = pl.pallas_call(
        kernel,
        out_shape=(
            jax.ShapeDtypeStruct((T_pad, B, H), out_dtype),
            jax.ShapeDtypeStruct((B, H), out_dtype),
            jax.ShapeDtypeStruct((B, H), out_dtype),
        ),
        grid_spec=grid_spec,
        compiler_params=pltpu.CompilerParams(
            # Batch chunks are independent ('parallel', uses v7x's 2 TCs); the recurrence
            # over time chunks must stay sequential ('arbitrary') so the VMEM carries and
            # the deferred h_n/c_n writeback remain valid.
            dimension_semantics=("parallel", "arbitrary"),
            vmem_limit_bytes=vmem_limit,
        ),
    )(gates_x, w_hh_masked_t)

    return y_pad[:T], h_n, c_n


# ---------------------------------------------------------------------------
# Pure-JAX (f32) reference of the same forward, for the sanity check.
# ---------------------------------------------------------------------------
def _reference(x, w_ih, w_hh_raw, mask, b_ih, b_hh):
    T, B, I = x.shape
    H = w_hh_raw.shape[1]
    w_hh = w_hh_raw * mask
    bias = b_ih + b_hh

    def step(carry, x_t):
        h, c = carry
        gates = x_t @ w_ih.T + h @ w_hh.T + bias
        i_g = jax.nn.sigmoid(gates[:, 0 * H:1 * H])
        f_g = jax.nn.sigmoid(gates[:, 1 * H:2 * H])
        g_g = jnp.tanh(gates[:, 2 * H:3 * H])
        o_g = jax.nn.sigmoid(gates[:, 3 * H:4 * H])
        c = f_g * c + i_g * g_g
        h = o_g * jnp.tanh(c)
        return (h, c), h

    h0 = jnp.zeros((B, H), x.dtype)
    c0 = jnp.zeros((B, H), x.dtype)
    (hN, cN), ys = jax.lax.scan(step, (h0, c0), x)
    return ys, hN, cN


if __name__ == "__main__":
    # Small shapes: seq T=12 (deliberately not a multiple of the time chunk, to exercise
    # the padded-tail masking), batch B=2, ninput I=16, nhidden H=32 -> 4H = 128 lanes.
    T, B, I, H = 12, 2, 16, 32
    dropout_p = 0.5

    key = jax.random.PRNGKey(0)
    kx, kwi, kwh, kbi, kbh, kmask = jax.random.split(key, 6)

    bound = 1.0 / jnp.sqrt(jnp.float32(H))   # PyTorch LSTM default init range
    x = jax.random.normal(kx, (T, B, I), jnp.float32)
    w_ih = jax.random.uniform(kwi, (4 * H, I), jnp.float32, -bound, bound)
    w_hh_raw = jax.random.uniform(kwh, (4 * H, H), jnp.float32, -bound, bound)
    b_ih = jax.random.uniform(kbi, (4 * H,), jnp.float32, -bound, bound)
    b_hh = jax.random.uniform(kbh, (4 * H,), jnp.float32, -bound, bound)

    # Variational dropout mask sampled ONCE per forward: shape (4H, 1), values in
    # {0, 1/(1-p)} exactly like torch.nn.functional.dropout(ones, p, training=True).
    keep = jax.random.bernoulli(kmask, 1.0 - dropout_p, (4 * H, 1))
    mask = keep.astype(jnp.float32) / (1.0 - dropout_p)

    y, h_n, c_n = weight_drop_lstm(x, w_ih, w_hh_raw, mask, b_ih, b_hh, time_chunk=8)
    jax.block_until_ready((y, h_n, c_n))

    y_ref, h_ref, c_ref = _reference(x, w_ih, w_hh_raw, mask, b_ih, b_hh)
    # bf16 MXU inputs (weights / pre-activations / h) with f32 accumulation & f32 carries:
    # compare against the pure-f32 reference at bf16-appropriate tolerance.
    assert jnp.allclose(y, y_ref, atol=2e-2, rtol=2e-2)
    assert jnp.allclose(h_n, h_ref, atol=2e-2, rtol=2e-2)
    assert jnp.allclose(c_n, c_ref, atol=2e-2, rtol=2e-2)

    print("KERNEL_OK")
</pallas_src>

<mosaic_0001>
module attributes {stable_mosaic.version = 11 : i64} {
  func.func @_lstm_recurrent_kernel(%arg0: i32, %arg1: i32, %arg2: memref<8x2x128xbf16, #tpu.memory_space<vmem>>, %arg3: memref<32x128xbf16, #tpu.memory_space<any>>, %arg4: memref<8x2x32xf32, #tpu.memory_space<vmem>>, %arg5: memref<2x32xf32, #tpu.memory_space<vmem>>, %arg6: memref<2x32xf32, #tpu.memory_space<vmem>>, %arg7: memref<32x128xbf16, #tpu.memory_space<vmem>>, %arg8: memref<2x32xf32, #tpu.memory_space<vmem>>, %arg9: memref<2x32xf32, #tpu.memory_space<vmem>>, %arg10: memref<!tpu.dma_semaphore, #tpu.memory_space<semaphore_mem>>) attributes {dimension_semantics = [#tpu.dimension_semantics<parallel>, #tpu.dimension_semantics<arbitrary>], iteration_bounds = array<i64: 1, 2>, scalar_prefetch = 0 : i64, scratch_operands = 4 : i64, tpu.core_type = #tpu.core_type<tc>, window_params = [{transform_indices = @transform_0, window_bounds = array<i64: 8, 2, 128>}, {}, {transform_indices = @transform_2, window_bounds = array<i64: 8, 2, 32>}, {transform_indices = @transform_3, window_bounds = array<i64: 2, 32>}, {transform_indices = @transform_4, window_bounds = array<i64: 2, 32>}]} {
    %c0_i32 = arith.constant 0 : i32
    %0 = arith.cmpi eq, %arg1, %c0_i32 : i32
    %1 = arith.extui %0 : i1 to i32
    %c0_i32_0 = arith.constant 0 : i32
    %2 = arith.cmpi ne, %1, %c0_i32_0 : i32
    scf.if %2 {
      tpu.enqueue_dma source(%arg3 : memref<32x128xbf16, #tpu.memory_space<any>>) target(%arg7 : memref<32x128xbf16, #tpu.memory_space<vmem>>) target_semaphore(%arg10 : memref<!tpu.dma_semaphore, #tpu.memory_space<semaphore_mem>>)
      tpu.wait_dma2 semaphore(%arg10 : memref<!tpu.dma_semaphore, #tpu.memory_space<semaphore_mem>>) src(%arg3 : memref<32x128xbf16, #tpu.memory_space<any>>) dst(%arg7 : memref<32x128xbf16, #tpu.memory_space<vmem>>)
      %cst_100 = arith.constant 0.000000e+00 : f32
      %428 = vector.broadcast %cst_100 : f32 to vector<2x32xf32>
      %c0_101 = arith.constant 0 : index
      %c0_102 = arith.constant 0 : index
      %429 = vector.load %arg8[%c0_101, %c0_102] : memref<2x32xf32, #tpu.memory_space<vmem>>, vector<2x32xf32>
      tpu.vector_store %arg8[%c0_101, %c0_102], %428 {strides = array<i32>} : memref<2x32xf32, #tpu.memory_space<vmem>>, vector<2x32xf32>,
      %cst_103 = arith.constant 0.000000e+00 : f32
      %430 = vector.broadcast %cst_103 : f32 to vector<2x32xf32>
      %c0_104 = arith.constant 0 : index
      %c0_105 = arith.constant 0 : index
      %431 = vector.load %arg9[%c0_104, %c0_105] : memref<2x32xf32, #tpu.memory_space<vmem>>, vector<2x32xf32>
      tpu.vector_store %arg9[%c0_104, %c0_105], %430 {strides = array<i32>} : memref<2x32xf32, #tpu.memory_space<vmem>>, vector<2x32xf32>,
    } else {
    }
    %c0 = arith.constant 0 : index
    %c0_1 = arith.constant 0 : index
    %3 = vector.load %arg7[%c0, %c0_1] : memref<32x128xbf16, #tpu.memory_space<vmem>>, vector<32x128xbf16>
    %c8_i32 = arith.constant 8 : i32
    %4 = arith.muli %arg1, %c8_i32 : i32
    %c0_2 = arith.constant 0 : index
    %c0_3 = arith.constant 0 : index
    %5 = vector.load %arg8[%c0_2, %c0_3] : memref<2x32xf32, #tpu.memory_space<vmem>>, vector<2x32xf32>
    %c0_4 = arith.constant 0 : index
    %c0_5 = arith.constant 0 : index
    %6 = vector.load %arg9[%c0_4, %c0_5] : memref<2x32xf32, #tpu.memory_space<vmem>>, vector<2x32xf32>
    %c0_i32_6 = arith.constant 0 : i32
    %7 = arith.index_cast %c0_i32_6 : i32 to index
    %c0_7 = arith.constant 0 : index
    %c0_8 = arith.constant 0 : index
    %8 = vector.load %arg2[%7, %c0_7, %c0_8] : memref<8x2x128xbf16, #tpu.memory_space<vmem>>, vector<1x2x128xbf16>
    %9 = vector.shape_cast %8 : vector<1x2x128xbf16> to vector<2x128xbf16>
    %10 = arith.extf %9 : vector<2x128xbf16> to vector<2x128xf32>
    %11 = arith.truncf %5 : vector<2x32xf32> to vector<2x32xbf16>
    %cst = arith.constant dense<0.000000e+00> : vector<2x128xf32>
    %12 = tpu.matmul %11, %3, %cst {dimension_numbers = #tpu.dot_dimension_numbers<[1], [0], [0], [1], [0, 0, 1, 1], [], []>} : vector<2x32xbf16>, vector<32x128xbf16>, vector<2x128xf32> -> vector<2x128xf32>
    %13 = arith.addf %10, %12 : vector<2x128xf32>
    %14 = vector.extract_strided_slice %13 {offsets = [0, 0], sizes = [2, 32], strides = [1, 1]} : vector<2x128xf32> to vector<2x32xf32>
    %15 = arith.negf %14 : vector<2x32xf32>
    %16 = math.exp %15 : vector<2x32xf32>
    %cst_9 = arith.constant 1.000000e+00 : f32
    %17 = vector.broadcast %cst_9 : f32 to vector<2x32xf32>
    %18 = arith.addf %17, %16 : vector<2x32xf32>
    %19 = arith.divf %17, %18 : vector<2x32xf32>
    %20 = vector.extract_strided_slice %13 {offsets = [0, 32], sizes = [2, 32], strides = [1, 1]} : vector<2x128xf32> to vector<2x32xf32>
    %21 = arith.negf %20 : vector<2x32xf32>
    %22 = math.exp %21 : vector<2x32xf32>
    %cst_10 = arith.constant 1.000000e+00 : f32
    %23 = vector.broadcast %cst_10 : f32 to vector<2x32xf32>
    %24 = arith.addf %23, %22 : vector<2x32xf32>
    %25 = arith.divf %23, %24 : vector<2x32xf32>
    %26 = vector.extract_strided_slice %13 {offsets = [0, 64], sizes = [2, 32], strides = [1, 1]} : vector<2x128xf32> to vector<2x32xf32>
    %27 = math.tanh %26 : vector<2x32xf32>
    %28 = vector.extract_strided_slice %13 {offsets = [0, 96], sizes = [2, 32], strides = [1, 1]} : vector<2x128xf32> to vector<2x32xf32>
    %29 = arith.negf %28 : vector<2x32xf32>
    %30 = math.exp %29 : vector<2x32xf32>
    %cst_11 = arith.constant 1.000000e+00 : f32
    %31 = vector.broadcast %cst_11 : f32 to vector<2x32xf32>
    %32 = arith.addf %31, %30 : vector<2x32xf32>
    %33 = arith.divf %31, %32 : vector<2x32xf32>
    %34 = arith.mulf %25, %6 : vector<2x32xf32>
    %35 = arith.mulf %19, %27 : vector<2x32xf32>
    %36 = arith.addf %34, %35 : vector<2x32xf32>
    %37 = math.tanh %36 : vector<2x32xf32>
    %38 = arith.mulf %33, %37 : vector<2x32xf32>
    %39 = arith.index_cast %c0_i32_6 : i32 to index
    %c0_12 = arith.constant 0 : index
    %c0_13 = arith.constant 0 : index
    %40 = vector.load %arg4[%39, %c0_12, %c0_13] : memref<8x2x32xf32, #tpu.memory_space<vmem>>, vector<1x2x32xf32>
    %41 = vector.shape_cast %40 : vector<1x2x32xf32> to vector<2x32xf32>
    %42 = vector.shape_cast %38 : vector<2x32xf32> to vector<1x2x32xf32>
    tpu.vector_store %arg4[%39, %c0_12, %c0_13], %42 {strides = array<i32>} : memref<8x2x32xf32, #tpu.memory_space<vmem>>, vector<1x2x32xf32>,
    %43 = arith.addi %4, %c0_i32_6 : i32
    %c12_i32 = arith.constant 12 : i32
    %44 = arith.cmpi slt, %43, %c12_i32 : i32
    %45 = arith.extui %44 : i1 to i32
    %46 = arith.sitofp %45 : i32 to f32
    %47 = vector.broadcast %46 : f32 to vector<2x32xf32>
    %48 = arith.mulf %47, %38 : vector<2x32xf32>
    %cst_14 = arith.constant 1.000000e+00 : f32
    %49 = arith.subf %cst_14, %46 : f32
    %50 = vector.broadcast %49 : f32 to vector<2x32xf32>
    %51 = arith.mulf %50, %5 : vector<2x32xf32>
    %52 = arith.addf %48, %51 : vector<2x32xf32>
    %53 = vector.broadcast %46 : f32 to vector<2x32xf32>
    %54 = arith.mulf %53, %36 : vector<2x32xf32>
    %cst_15 = arith.constant 1.000000e+00 : f32
    %55 = arith.subf %cst_15, %46 : f32
    %56 = vector.broadcast %55 : f32 to vector<2x32xf32>
    %57 = arith.mulf %56, %6 : vector<2x32xf32>
    %58 = arith.addf %54, %57 : vector<2x32xf32>
    %c1_i32 = arith.constant 1 : i32
    %59 = arith.index_cast %c1_i32 : i32 to index
    %c0_16 = arith.constant 0 : index
    %c0_17 = arith.constant 0 : index
    %60 = vector.load %arg2[%59, %c0_16, %c0_17] : memref<8x2x128xbf16, #tpu.memory_space<vmem>>, vector<1x2x128xbf16>
    %61 = vector.shape_cast %60 : vector<1x2x128xbf16> to vector<2x128xbf16>
    %62 = arith.extf %61 : vector<2x128xbf16> to vector<2x128xf32>
    %63 = arith.truncf %52 : vector<2x32xf32> to vector<2x32xbf16>
    %cst_18 = arith.constant dense<0.000000e+00> : vector<2x128xf32>
    %64 = tpu.matmul %63, %3, %cst_18 {dimension_numbers = #tpu.dot_dimension_numbers<[1], [0], [0], [1], [0, 0, 1, 1], [], []>} : vector<2x32xbf16>, vector<32x128xbf16>, vector<2x128xf32> -> vector<2x128xf32>
    %65 = arith.addf %62, %64 : vector<2x128xf32>
    %66 = vector.extract_strided_slice %65 {offsets = [0, 0], sizes = [2, 32], strides = [1, 1]} : vector<2x128xf32> to vector<2x32xf32>
    %67 = arith.negf %66 : vector<2x32xf32>
    %68 = math.exp %67 : vector<2x32xf32>
    %cst_19 = arith.constant 1.000000e+00 : f32
    %69 = vector.broadcast %cst_19 : f32 to vector<2x32xf32>
    %70 = arith.addf %69, %68 : vector<2x32xf32>
    %71 = arith.divf %69, %70 : vector<2x32xf32>
    %72 = vector.extract_strided_slice %65 {offsets = [0, 32], sizes = [2, 32], strides = [1, 1]} : vector<2x128xf32> to vector<2x32xf32>
    %73 = arith.negf %72 : vector<2x32xf32>
    %74 = math.exp %73 : vector<2x32xf32>
    %cst_20 = arith.constant 1.000000e+00 : f32
    %75 = vector.broadcast %cst_20 : f32 to vector<2x32xf32>
    %76 = arith.addf %75, %74 : vector<2x32xf32>
    %77 = arith.divf %75, %76 : vector<2x32xf32>
    %78 = vector.extract_strided_slice %65 {offsets = [0, 64], sizes = [2, 32], strides = [1, 1]} : vector<2x128xf32> to vector<2x32xf32>
    %79 = math.tanh %78 : vector<2x32xf32>
    %80 = vector.extract_strided_slice %65 {offsets = [0, 96], sizes = [2, 32], strides = [1, 1]} : vector<2x128xf32> to vector<2x32xf32>
    %81 = arith.negf %80 : vector<2x32xf32>
    %82 = math.exp %81 : vector<2x32xf32>
    %cst_21 = arith.constant 1.000000e+00 : f32
    %83 = vector.broadcast %cst_21 : f32 to vector<2x32xf32>
    %84 = arith.addf %83, %82 : vector<2x32xf32>
    %85 = arith.divf %83, %84 : vector<2x32xf32>
    %86 = arith.mulf %77, %58 : vector<2x32xf32>
    %87 = arith.mulf %71, %79 : vector<2x32xf32>
    %88 = arith.addf %86, %87 : vector<2x32xf32>
    %89 = math.tanh %88 : vector<2x32xf32>
    %90 = arith.mulf %85, %89 : vector<2x32xf32>
    %91 = arith.index_cast %c1_i32 : i32 to index
    %c0_22 = arith.constant 0 : index
    %c0_23 = arith.constant 0 : index
    %92 = vector.load %arg4[%91, %c0_22, %c0_23] : memref<8x2x32xf32, #tpu.memory_space<vmem>>, vector<1x2x32xf32>
    %93 = vector.shape_cast %92 : vector<1x2x32xf32> to vector<2x32xf32>
    %94 = vector.shape_cast %90 : vector<2x32xf32> to vector<1x2x32xf32>
    tpu.vector_store %arg4[%91, %c0_22, %c0_23], %94 {strides = array<i32>} : memref<8x2x32xf32, #tpu.memory_space<vmem>>, vector<1x2x32xf32>,
    %95 = arith.addi %4, %c1_i32 : i32
    %c12_i32_24 = arith.constant 12 : i32
    %96 = arith.cmpi slt, %95, %c12_i32_24 : i32
    %97 = arith.extui %96 : i1 to i32
    %98 = arith.sitofp %97 : i32 to f32
    %99 = vector.broadcast %98 : f32 to vector<2x32xf32>
    %100 = arith.mulf %99, %90 : vector<2x32xf32>
    %cst_25 = arith.constant 1.000000e+00 : f32
    %101 = arith.subf %cst_25, %98 : f32
    %102 = vector.broadcast %101 : f32 to vector<2x32xf32>
    %103 = arith.mulf %102, %52 : vector<2x32xf32>
    %104 = arith.addf %100, %103 : vector<2x32xf32>
    %105 = vector.broadcast %98 : f32 to vector<2x32xf32>
    %106 = arith.mulf %105, %88 : vector<2x32xf32>
    %cst_26 = arith.constant 1.000000e+00 : f32
    %107 = arith.subf %cst_26, %98 : f32
    %108 = vector.broadcast %107 : f32 to vector<2x32xf32>
    %109 = arith.mulf %108, %58 : vector<2x32xf32>
    %110 = arith.addf %106, %109 : vector<2x32xf32>
    %c2_i32 = arith.constant 2 : i32
    %111 = arith.index_cast %c2_i32 : i32 to index
    %c0_27 = arith.constant 0 : index
    %c0_28 = arith.constant 0 : index
    %112 = vector.load %arg2[%111, %c0_27, %c0_28] : memref<8x2x128xbf16, #tpu.memory_space<vmem>>, vector<1x2x128xbf16>
    %113 = vector.shape_cast %112 : vector<1x2x128xbf16> to vector<2x128xbf16>
    %114 = arith.extf %113 : vector<2x128xbf16> to vector<2x128xf32>
    %115 = arith.truncf %104 : vector<2x32xf32> to vector<2x32xbf16>
    %cst_29 = arith.constant dense<0.000000e+00> : vector<2x128xf32>
    %116 = tpu.matmul %115, %3, %cst_29 {dimension_numbers = #tpu.dot_dimension_numbers<[1], [0], [0], [1], [0, 0, 1, 1], [], []>} : vector<2x32xbf16>, vector<32x128xbf16>, vector<2x128xf32> -> vector<2x128xf32>
    %117 = arith.addf %114, %116 : vector<2x128xf32>
    %118 = vector.extract_strided_slice %117 {offsets = [0, 0], sizes = [2, 32], strides = [1, 1]} : vector<2x128xf32> to vector<2x32xf32>
    %119 = arith.negf %118 : vector<2x32xf32>
    %120 = math.exp %119 : vector<2x32xf32>
    %cst_30 = arith.constant 1.000000e+00 : f32
    %121 = vector.broadcast %cst_30 : f32 to vector<2x32xf32>
    %122 = arith.addf %121, %120 : vector<2x32xf32>
    %123 = arith.divf %121, %122 : vector<2x32xf32>
    %124 = vector.extract_strided_slice %117 {offsets = [0, 32], sizes = [2, 32], strides = [1, 1]} : vector<2x128xf32> to vector<2x32xf32>
    %125 = arith.negf %124 : vector<2x32xf32>
    %126 = math.exp %125 : vector<2x32xf32>
    %cst_31 = arith.constant 1.000000e+00 : f32
    %127 = vector.broadcast %cst_31 : f32 to vector<2x32xf32>
    %128 = arith.addf %127, %126 : vector<2x32xf32>
    %129 = arith.divf %127, %128 : vector<2x32xf32>
    %130 = vector.extract_strided_slice %117 {offsets = [0, 64], sizes = [2, 32], strides = [1, 1]} : vector<2x128xf32> to vector<2x32xf32>
    %131 = math.tanh %130 : vector<2x32xf32>
    %132 = vector.extract_strided_slice %117 {offsets = [0, 96], sizes = [2, 32], strides = [1, 1]} : vector<2x128xf32> to vector<2x32xf32>
    %133 = arith.negf %132 : vector<2x32xf32>
    %134 = math.exp %133 : vector<2x32xf32>
    %cst_32 = arith.constant 1.000000e+00 : f32
    %135 = vector.broadcast %cst_32 : f32 to vector<2x32xf32>
    %136 = arith.addf %135, %134 : vector<2x32xf32>
    %137 = arith.divf %135, %136 : vector<2x32xf32>
    %138 = arith.mulf %129, %110 : vector<2x32xf32>
    %139 = arith.mulf %123, %131 : vector<2x32xf32>
    %140 = arith.addf %138, %139 : vector<2x32xf32>
    %141 = math.tanh %140 : vector<2x32xf32>
    %142 = arith.mulf %137, %141 : vector<2x32xf32>
    %143 = arith.index_cast %c2_i32 : i32 to index
    %c0_33 = arith.constant 0 : index
    %c0_34 = arith.constant 0 : index
    %144 = vector.load %arg4[%143, %c0_33, %c0_34] : memref<8x2x32xf32, #tpu.memory_space<vmem>>, vector<1x2x32xf32>
    %145 = vector.shape_cast %144 : vector<1x2x32xf32> to vector<2x32xf32>
    %146 = vector.shape_cast %142 : vector<2x32xf32> to vector<1x2x32xf32>
    tpu.vector_store %arg4[%143, %c0_33, %c0_34], %146 {strides = array<i32>} : memref<8x2x32xf32, #tpu.memory_space<vmem>>, vector<1x2x32xf32>,
    %147 = arith.addi %4, %c2_i32 : i32
    %c12_i32_35 = arith.constant 12 : i32
    %148 = arith.cmpi slt, %147, %c12_i32_35 : i32
    %149 = arith.extui %148 : i1 to i32
    %150 = arith.sitofp %149 : i32 to f32
    %151 = vector.broadcast %150 : f32 to vector<2x32xf32>
    %152 = arith.mulf %151, %142 : vector<2x32xf32>
    %cst_36 = arith.constant 1.000000e+00 : f32
    %153 = arith.subf %cst_36, %150 : f32
    %154 = vector.broadcast %153 : f32 to vector<2x32xf32>
    %155 = arith.mulf %154, %104 : vector<2x32xf32>
    %156 = arith.addf %152, %155 : vector<2x32xf32>
    %157 = vector.broadcast %150 : f32 to vector<2x32xf32>
    %158 = arith.mulf %157, %140 : vector<2x32xf32>
    %cst_37 = arith.constant 1.000000e+00 : f32
    %159 = arith.subf %cst_37, %150 : f32
    %160 = vector.broadcast %159 : f32 to vector<2x32xf32>
    %161 = arith.mulf %160, %110 : vector<2x32xf32>
    %162 = arith.addf %158, %161 : vector<2x32xf32>
    %c3_i32 = arith.constant 3 : i32
    %163 = arith.index_cast %c3_i32 : i32 to index
    %c0_38 = arith.constant 0 : index
    %c0_39 = arith.constant 0 : index
    %164 = vector.load %arg2[%163, %c0_38, %c0_39] : memref<8x2x128xbf16, #tpu.memory_space<vmem>>, vector<1x2x128xbf16>
    %165 = vector.shape_cast %164 : vector<1x2x128xbf16> to vector<2x128xbf16>
    %166 = arith.extf %165 : vector<2x128xbf16> to vector<2x128xf32>
    %167 = arith.truncf %156 : vector<2x32xf32> to vector<2x32xbf16>
    %cst_40 = arith.constant dense<0.000000e+00> : vector<2x128xf32>
    %168 = tpu.matmul %167, %3, %cst_40 {dimension_numbers = #tpu.dot_dimension_numbers<[1], [0], [0], [1], [0, 0, 1, 1], [], []>} : vector<2x32xbf16>, vector<32x128xbf16>, vector<2x128xf32> -> vector<2x128xf32>
    %169 = arith.addf %166, %168 : vector<2x128xf32>
    %170 = vector.extract_strided_slice %169 {offsets = [0, 0], sizes = [2, 32], strides = [1, 1]} : vector<2x128xf32> to vector<2x32xf32>
    %171 = arith.negf %170 : vector<2x32xf32>
    %172 = math.exp %171 : vector<2x32xf32>
    %cst_41 = arith.constant 1.000000e+00 : f32
    %173 = vector.broadcast %cst_41 : f32 to vector<2x32xf32>
    %174 = arith.addf %173, %172 : vector<2x32xf32>
    %175 = arith.divf %173, %174 : vector<2x32xf32>
    %176 = vector.extract_strided_slice %169 {offsets = [0, 32], sizes = [2, 32], strides = [1, 1]} : vector<2x128xf32> to vector<2x32xf32>
    %177 = arith.negf %176 : vector<2x32xf32>
    %178 = math.exp %177 : vector<2x32xf32>
    %cst_42 = arith.constant 1.000000e+00 : f32
    %179 = vector.broadcast %cst_42 : f32 to vector<2x32xf32>
    %180 = arith.addf %179, %178 : vector<2x32xf32>
    %181 = arith.divf %179, %180 : vector<2x32xf32>
    %182 = vector.extract_strided_slice %169 {offsets = [0, 64], sizes = [2, 32], strides = [1, 1]} : vector<2x128xf32> to vector<2x32xf32>
    %183 = math.tanh %182 : vector<2x32xf32>
    %184 = vector.extract_strided_slice %169 {offsets = [0, 96], sizes = [2, 32], strides = [1, 1]} : vector<2x128xf32> to vector<2x32xf32>
    %185 = arith.negf %184 : vector<2x32xf32>
    %186 = math.exp %185 : vector<2x32xf32>
    %cst_43 = arith.constant 1.000000e+00 : f32
    %187 = vector.broadcast %cst_43 : f32 to vector<2x32xf32>
    %188 = arith.addf %187, %186 : vector<2x32xf32>
    %189 = arith.divf %187, %188 : vector<2x32xf32>
    %190 = arith.mulf %181, %162 : vector<2x32xf32>
    %191 = arith.mulf %175, %183 : vector<2x32xf32>
    %192 = arith.addf %190, %191 : vector<2x32xf32>
    %193 = math.tanh %192 : vector<2x32xf32>
    %194 = arith.mulf %189, %193 : vector<2x32xf32>
    %195 = arith.index_cast %c3_i32 : i32 to index
    %c0_44 = arith.constant 0 : index
    %c0_45 = arith.constant 0 : index
    %196 = vector.load %arg4[%195, %c0_44, %c0_45] : memref<8x2x32xf32, #tpu.memory_space<vmem>>, vector<1x2x32xf32>
    %197 = vector.shape_cast %196 : vector<1x2x32xf32> to vector<2x32xf32>
    %198 = vector.shape_cast %194 : vector<2x32xf32> to vector<1x2x32xf32>
    tpu.vector_store %arg4[%195, %c0_44, %c0_45], %198 {strides = array<i32>} : memref<8x2x32xf32, #tpu.memory_space<vmem>>, vector<1x2x32xf32>,
    %199 = arith.addi %4, %c3_i32 : i32
    %c12_i32_46 = arith.constant 12 : i32
    %200 = arith.cmpi slt, %199, %c12_i32_46 : i32
    %201 = arith.extui %200 : i1 to i32
    %202 = arith.sitofp %201 : i32 to f32
    %203 = vector.broadcast %202 : f32 to vector<2x32xf32>
    %204 = arith.mulf %203, %194 : vector<2x32xf32>
    %cst_47 = arith.constant 1.000000e+00 : f32
    %205 = arith.subf %cst_47, %202 : f32
    %206 = vector.broadcast %205 : f32 to vector<2x32xf32>
    %207 = arith.mulf %206, %156 : vector<2x32xf32>
    %208 = arith.addf %204, %207 : vector<2x32xf32>
    %209 = vector.broadcast %202 : f32 to vector<2x32xf32>
    %210 = arith.mulf %209, %192 : vector<2x32xf32>
    %cst_48 = arith.constant 1.000000e+00 : f32
    %211 = arith.subf %cst_48, %202 : f32
    %212 = vector.broadcast %211 : f32 to vector<2x32xf32>
    %213 = arith.mulf %212, %162 : vector<2x32xf32>
    %214 = arith.addf %210, %213 : vector<2x32xf32>
    %c4_i32 = arith.constant 4 : i32
    %215 = arith.index_cast %c4_i32 : i32 to index
    %c0_49 = arith.constant 0 : index
    %c0_50 = arith.constant 0 : index
    %216 = vector.load %arg2[%215, %c0_49, %c0_50] : memref<8x2x128xbf16, #tpu.memory_space<vmem>>, vector<1x2x128xbf16>
    %217 = vector.shape_cast %216 : vector<1x2x128xbf16> to vector<2x128xbf16>
    %218 = arith.extf %217 : vector<2x128xbf16> to vector<2x128xf32>
    %219 = arith.truncf %208 : vector<2x32xf32> to vector<2x32xbf16>
    %cst_51 = arith.constant dense<0.000000e+00> : vector<2x128xf32>
    %220 = tpu.matmul %219, %3, %cst_51 {dimension_numbers = #tpu.dot_dimension_numbers<[1], [0], [0], [1], [0, 0, 1, 1], [], []>} : vector<2x32xbf16>, vector<32x128xbf16>, vector<2x128xf32> -> vector<2x128xf32>
    %221 = arith.addf %218, %220 : vector<2x128xf32>
    %222 = vector.extract_strided_slice %221 {offsets = [0, 0], sizes = [2, 32], strides = [1, 1]} : vector<2x128xf32> to vector<2x32xf32>
    %223 = arith.negf %222 : vector<2x32xf32>
    %224 = math.exp %223 : vector<2x32xf32>
    %cst_52 = arith.constant 1.000000e+00 : f32
    %225 = vector.broadcast %cst_52 : f32 to vector<2x32xf32>
    %226 = arith.addf %225, %224 : vector<2x32xf32>
    %227 = arith.divf %225, %226 : vector<2x32xf32>
    %228 = vector.extract_strided_slice %221 {offsets = [0, 32], sizes = [2, 32], strides = [1, 1]} : vector<2x128xf32> to vector<2x32xf32>
    %229 = arith.negf %228 : vector<2x32xf32>
    %230 = math.exp %229 : vector<2x32xf32>
    %cst_53 = arith.constant 1.000000e+00 : f32
    %231 = vector.broadcast %cst_53 : f32 to vector<2x32xf32>
    %232 = arith.addf %231, %230 : vector<2x32xf32>
    %233 = arith.divf %231, %232 : vector<2x32xf32>
    %234 = vector.extract_strided_slice %221 {offsets = [0, 64], sizes = [2, 32], strides = [1, 1]} : vector<2x128xf32> to vector<2x32xf32>
    %235 = math.tanh %234 : vector<2x32xf32>
    %236 = vector.extract_strided_slice %221 {offsets = [0, 96], sizes = [2, 32], strides = [1, 1]} : vector<2x128xf32> to vector<2x32xf32>
    %237 = arith.negf %236 : vector<2x32xf32>
    %238 = math.exp %237 : vector<2x32xf32>
    %cst_54 = arith.constant 1.000000e+00 : f32
    %239 = vector.broadcast %cst_54 : f32 to vector<2x32xf32>
    %240 = arith.addf %239, %238 : vector<2x32xf32>
    %241 = arith.divf %239, %240 : vector<2x32xf32>
    %242 = arith.mulf %233, %214 : vector<2x32xf32>
    %243 = arith.mulf %227, %235 : vector<2x32xf32>
    %244 = arith.addf %242, %243 : vector<2x32xf32>
    %245 = math.tanh %244 : vector<2x32xf32>
    %246 = arith.mulf %241, %245 : vector<2x32xf32>
    %247 = arith.index_cast %c4_i32 : i32 to index
    %c0_55 = arith.constant 0 : index
    %c0_56 = arith.constant 0 : index
    %248 = vector.load %arg4[%247, %c0_55, %c0_56] : memref<8x2x32xf32, #tpu.memory_space<vmem>>, vector<1x2x32xf32>
    %249 = vector.shape_cast %248 : vector<1x2x32xf32> to vector<2x32xf32>
    %250 = vector.shape_cast %246 : vector<2x32xf32> to vector<1x2x32xf32>
    tpu.vector_store %arg4[%247, %c0_55, %c0_56], %250 {strides = array<i32>} : memref<8x2x32xf32, #tpu.memory_space<vmem>>, vector<1x2x32xf32>,
    %251 = arith.addi %4, %c4_i32 : i32
    %c12_i32_57 = arith.constant 12 : i32
    %252 = arith.cmpi slt, %251, %c12_i32_57 : i32
    %253 = arith.extui %252 : i1 to i32
    %254 = arith.sitofp %253 : i32 to f32
    %255 = vector.broadcast %254 : f32 to vector<2x32xf32>
    %256 = arith.mulf %255, %246 : vector<2x32xf32>
    %cst_58 = arith.constant 1.000000e+00 : f32
    %257 = arith.subf %cst_58, %254 : f32
    %258 = vector.broadcast %257 : f32 to vector<2x32xf32>
    %259 = arith.mulf %258, %208 : vector<2x32xf32>
    %260 = arith.addf %256, %259 : vector<2x32xf32>
    %261 = vector.broadcast %254 : f32 to vector<2x32xf32>
    %262 = arith.mulf %261, %244 : vector<2x32xf32>
    %cst_59 = arith.constant 1.000000e+00 : f32
    %263 = arith.subf %cst_59, %254 : f32
    %264 = vector.broadcast %263 : f32 to vector<2x32xf32>
    %265 = arith.mulf %264, %214 : vector<2x32xf32>
    %266 = arith.addf %262, %265 : vector<2x32xf32>
    %c5_i32 = arith.constant 5 : i32
    %267 = arith.index_cast %c5_i32 : i32 to index
    %c0_60 = arith.constant 0 : index
    %c0_61 = arith.constant 0 : index
    %268 = vector.load %arg2[%267, %c0_60, %c0_61] : memref<8x2x128xbf16, #tpu.memory_space<vmem>>, vector<1x2x128xbf16>
    %269 = vector.shape_cast %268 : vector<1x2x128xbf16> to vector<2x128xbf16>
    %270 = arith.extf %269 : vector<2x128xbf16> to vector<2x128xf32>
    %271 = arith.truncf %260 : vector<2x32xf32> to vector<2x32xbf16>
    %cst_62 = arith.constant dense<0.000000e+00> : vector<2x128xf32>
    %272 = tpu.matmul %271, %3, %cst_62 {dimension_numbers = #tpu.dot_dimension_numbers<[1], [0], [0], [1], [0, 0, 1, 1], [], []>} : vector<2x32xbf16>, vector<32x128xbf16>, vector<2x128xf32> -> vector<2x128xf32>
    %273 = arith.addf %270, %272 : vector<2x128xf32>
    %274 = vector.extract_strided_slice %273 {offsets = [0, 0], sizes = [2, 32], strides = [1, 1]} : vector<2x128xf32> to vector<2x32xf32>
    %275 = arith.negf %274 : vector<2x32xf32>
    %276 = math.exp %275 : vector<2x32xf32>
    %cst_63 = arith.constant 1.000000e+00 : f32
    %277 = vector.broadcast %cst_63 : f32 to vector<2x32xf32>
    %278 = arith.addf %277, %276 : vector<2x32xf32>
    %279 = arith.divf %277, %278 : vector<2x32xf32>
    %280 = vector.extract_strided_slice %273 {offsets = [0, 32], sizes = [2, 32], strides = [1, 1]} : vector<2x128xf32> to vector<2x32xf32>
    %281 = arith.negf %280 : vector<2x32xf32>
    %282 = math.exp %281 : vector<2x32xf32>
    %cst_64 = arith.constant 1.000000e+00 : f32
    %283 = vector.broadcast %cst_64 : f32 to vector<2x32xf32>
    %284 = arith.addf %283, %282 : vector<2x32xf32>
    %285 = arith.divf %283, %284 : vector<2x32xf32>
    %286 = vector.extract_strided_slice %273 {offsets = [0, 64], sizes = [2, 32], strides = [1, 1]} : vector<2x128xf32> to vector<2x32xf32>
    %287 = math.tanh %286 : vector<2x32xf32>
    %288 = vector.extract_strided_slice %273 {offsets = [0, 96], sizes = [2, 32], strides = [1, 1]} : vector<2x128xf32> to vector<2x32xf32>
    %289 = arith.negf %288 : vector<2x32xf32>
    %290 = math.exp %289 : vector<2x32xf32>
    %cst_65 = arith.constant 1.000000e+00 : f32
    %291 = vector.broadcast %cst_65 : f32 to vector<2x32xf32>
    %292 = arith.addf %291, %290 : vector<2x32xf32>
    %293 = arith.divf %291, %292 : vector<2x32xf32>
    %294 = arith.mulf %285, %266 : vector<2x32xf32>
    %295 = arith.mulf %279, %287 : vector<2x32xf32>
    %296 = arith.addf %294, %295 : vector<2x32xf32>
    %297 = math.tanh %296 : vector<2x32xf32>
    %298 = arith.mulf %293, %297 : vector<2x32xf32>
    %299 = arith.index_cast %c5_i32 : i32 to index
    %c0_66 = arith.constant 0 : index
    %c0_67 = arith.constant 0 : index
    %300 = vector.load %arg4[%299, %c0_66, %c0_67] : memref<8x2x32xf32, #tpu.memory_space<vmem>>, vector<1x2x32xf32>
    %301 = vector.shape_cast %300 : vector<1x2x32xf32> to vector<2x32xf32>
    %302 = vector.shape_cast %298 : vector<2x32xf32> to vector<1x2x32xf32>
    tpu.vector_store %arg4[%299, %c0_66, %c0_67], %302 {strides = array<i32>} : memref<8x2x32xf32, #tpu.memory_space<vmem>>, vector<1x2x32xf32>,
    %303 = arith.addi %4, %c5_i32 : i32
    %c12_i32_68 = arith.constant 12 : i32
    %304 = arith.cmpi slt, %303, %c12_i32_68 : i32
    %305 = arith.extui %304 : i1 to i32
    %306 = arith.sitofp %305 : i32 to f32
    %307 = vector.broadcast %306 : f32 to vector<2x32xf32>
    %308 = arith.mulf %307, %298 : vector<2x32xf32>
    %cst_69 = arith.constant 1.000000e+00 : f32
    %309 = arith.subf %cst_69, %306 : f32
    %310 = vector.broadcast %309 : f32 to vector<2x32xf32>
    %311 = arith.mulf %310, %260 : vector<2x32xf32>
    %312 = arith.addf %308, %311 : vector<2x32xf32>
    %313 = vector.broadcast %306 : f32 to vector<2x32xf32>
    %314 = arith.mulf %313, %296 : vector<2x32xf32>
    %cst_70 = arith.constant 1.000000e+00 : f32
    %315 = arith.subf %cst_70, %306 : f32
    %316 = vector.broadcast %315 : f32 to vector<2x32xf32>
    %317 = arith.mulf %316, %266 : vector<2x32xf32>
    %318 = arith.addf %314, %317 : vector<2x32xf32>
    %c6_i32 = arith.constant 6 : i32
    %319 = arith.index_cast %c6_i32 : i32 to index
    %c0_71 = arith.constant 0 : index
    %c0_72 = arith.constant 0 : index
    %320 = vector.load %arg2[%319, %c0_71, %c0_72] : memref<8x2x128xbf16, #tpu.memory_space<vmem>>, vector<1x2x128xbf16>
    %321 = vector.shape_cast %320 : vector<1x2x128xbf16> to vector<2x128xbf16>
    %322 = arith.extf %321 : vector<2x128xbf16> to vector<2x128xf32>
    %323 = arith.truncf %312 : vector<2x32xf32> to vector<2x32xbf16>
    %cst_73 = arith.constant dense<0.000000e+00> : vector<2x128xf32>
    %324 = tpu.matmul %323, %3, %cst_73 {dimension_numbers = #tpu.dot_dimension_numbers<[1], [0], [0], [1], [0, 0, 1, 1], [], []>} : vector<2x32xbf16>, vector<32x128xbf16>, vector<2x128xf32> -> vector<2x128xf32>
    %325 = arith.addf %322, %324 : vector<2x128xf32>
    %326 = vector.extract_strided_slice %325 {offsets = [0, 0], sizes = [2, 32], strides = [1, 1]} : vector<2x128xf32> to vector<2x32xf32>
    %327 = arith.negf %326 : vector<2x32xf32>
    %328 = math.exp %327 : vector<2x32xf32>
    %cst_74 = arith.constant 1.000000e+00 : f32
    %329 = vector.broadcast %cst_74 : f32 to vector<2x32xf32>
    %330 = arith.addf %329, %328 : vector<2x32xf32>
    %331 = arith.divf %329, %330 : vector<2x32xf32>
    %332 = vector.extract_strided_slice %325 {offsets = [0, 32], sizes = [2, 32], strides = [1, 1]} : vector<2x128xf32> to vector<2x32xf32>
    %333 = arith.negf %332 : vector<2x32xf32>
    %334 = math.exp %333 : vector<2x32xf32>
    %cst_75 = arith.constant 1.000000e+00 : f32
    %335 = vector.broadcast %cst_75 : f32 to vector<2x32xf32>
    %336 = arith.addf %335, %334 : vector<2x32xf32>
    %337 = arith.divf %335, %336 : vector<2x32xf32>
    %338 = vector.extract_strided_slice %325 {offsets = [0, 64], sizes = [2, 32], strides = [1, 1]} : vector<2x128xf32> to vector<2x32xf32>
    %339 = math.tanh %338 : vector<2x32xf32>
    %340 = vector.extract_strided_slice %325 {offsets = [0, 96], sizes = [2, 32], strides = [1, 1]} : vector<2x128xf32> to vector<2x32xf32>
    %341 = arith.negf %340 : vector<2x32xf32>
    %342 = math.exp %341 : vector<2x32xf32>
    %cst_76 = arith.constant 1.000000e+00 : f32
    %343 = vector.broadcast %cst_76 : f32 to vector<2x32xf32>
    %344 = arith.addf %343, %342 : vector<2x32xf32>
    %345 = arith.divf %343, %344 : vector<2x32xf32>
    %346 = arith.mulf %337, %318 : vector<2x32xf32>
    %347 = arith.mulf %331, %339 : vector<2x32xf32>
    %348 = arith.addf %346, %347 : vector<2x32xf32>
    %349 = math.tanh %348 : vector<2x32xf32>
    %350 = arith.mulf %345, %349 : vector<2x32xf32>
    %351 = arith.index_cast %c6_i32 : i32 to index
    %c0_77 = arith.constant 0 : index
    %c0_78 = arith.constant 0 : index
    %352 = vector.load %arg4[%351, %c0_77, %c0_78] : memref<8x2x32xf32, #tpu.memory_space<vmem>>, vector<1x2x32xf32>
    %353 = vector.shape_cast %352 : vector<1x2x32xf32> to vector<2x32xf32>
    %354 = vector.shape_cast %350 : vector<2x32xf32> to vector<1x2x32xf32>
    tpu.vector_store %arg4[%351, %c0_77, %c0_78], %354 {strides = array<i32>} : memref<8x2x32xf32, #tpu.memory_space<vmem>>, vector<1x2x32xf32>,
    %355 = arith.addi %4, %c6_i32 : i32
    %c12_i32_79 = arith.constant 12 : i32
    %356 = arith.cmpi slt, %355, %c12_i32_79 : i32
    %357 = arith.extui %356 : i1 to i32
    %358 = arith.sitofp %357 : i32 to f32
    %359 = vector.broadcast %358 : f32 to vector<2x32xf32>
    %360 = arith.mulf %359, %350 : vector<2x32xf32>
    %cst_80 = arith.constant 1.000000e+00 : f32
    %361 = arith.subf %cst_80, %358 : f32
    %362 = vector.broadcast %361 : f32 to vector<2x32xf32>
    %363 = arith.mulf %362, %312 : vector<2x32xf32>
    %364 = arith.addf %360, %363 : vector<2x32xf32>
    %365 = vector.broadcast %358 : f32 to vector<2x32xf32>
    %366 = arith.mulf %365, %348 : vector<2x32xf32>
    %cst_81 = arith.constant 1.000000e+00 : f32
    %367 = arith.subf %cst_81, %358 : f32
    %368 = vector.broadcast %367 : f32 to vector<2x32xf32>
    %369 = arith.mulf %368, %318 : vector<2x32xf32>
    %370 = arith.addf %366, %369 : vector<2x32xf32>
    %c7_i32 = arith.constant 7 : i32
    %371 = arith.index_cast %c7_i32 : i32 to index
    %c0_82 = arith.constant 0 : index
    %c0_83 = arith.constant 0 : index
    %372 = vector.load %arg2[%371, %c0_82, %c0_83] : memref<8x2x128xbf16, #tpu.memory_space<vmem>>, vector<1x2x128xbf16>
    %373 = vector.shape_cast %372 : vector<1x2x128xbf16> to vector<2x128xbf16>
    %374 = arith.extf %373 : vector<2x128xbf16> to vector<2x128xf32>
    %375 = arith.truncf %364 : vector<2x32xf32> to vector<2x32xbf16>
    %cst_84 = arith.constant dense<0.000000e+00> : vector<2x128xf32>
    %376 = tpu.matmul %375, %3, %cst_84 {dimension_numbers = #tpu.dot_dimension_numbers<[1], [0], [0], [1], [0, 0, 1, 1], [], []>} : vector<2x32xbf16>, vector<32x128xbf16>, vector<2x128xf32> -> vector<2x128xf32>
    %377 = arith.addf %374, %376 : vector<2x128xf32>
    %378 = vector.extract_strided_slice %377 {offsets = [0, 0], sizes = [2, 32], strides = [1, 1]} : vector<2x128xf32> to vector<2x32xf32>
    %379 = arith.negf %378 : vector<2x32xf32>
    %380 = math.exp %379 : vector<2x32xf32>
    %cst_85 = arith.constant 1.000000e+00 : f32
    %381 = vector.broadcast %cst_85 : f32 to vector<2x32xf32>
    %382 = arith.addf %381, %380 : vector<2x32xf32>
    %383 = arith.divf %381, %382 : vector<2x32xf32>
    %384 = vector.extract_strided_slice %377 {offsets = [0, 32], sizes = [2, 32], strides = [1, 1]} : vector<2x128xf32> to vector<2x32xf32>
    %385 = arith.negf %384 : vector<2x32xf32>
    %386 = math.exp %385 : vector<2x32xf32>
    %cst_86 = arith.constant 1.000000e+00 : f32
    %387 = vector.broadcast %cst_86 : f32 to vector<2x32xf32>
    %388 = arith.addf %387, %386 : vector<2x32xf32>
    %389 = arith.divf %387, %388 : vector<2x32xf32>
    %390 = vector.extract_strided_slice %377 {offsets = [0, 64], sizes = [2, 32], strides = [1, 1]} : vector<2x128xf32> to vector<2x32xf32>
    %391 = math.tanh %390 : vector<2x32xf32>
    %392 = vector.extract_strided_slice %377 {offsets = [0, 96], sizes = [2, 32], strides = [1, 1]} : vector<2x128xf32> to vector<2x32xf32>
    %393 = arith.negf %392 : vector<2x32xf32>
    %394 = math.exp %393 : vector<2x32xf32>
    %cst_87 = arith.constant 1.000000e+00 : f32
    %395 = vector.broadcast %cst_87 : f32 to vector<2x32xf32>
    %396 = arith.addf %395, %394 : vector<2x32xf32>
    %397 = arith.divf %395, %396 : vector<2x32xf32>
    %398 = arith.mulf %389, %370 : vector<2x32xf32>
    %399 = arith.mulf %383, %391 : vector<2x32xf32>
    %400 = arith.addf %398, %399 : vector<2x32xf32>
    %401 = math.tanh %400 : vector<2x32xf32>
    %402 = arith.mulf %397, %401 : vector<2x32xf32>
    %403 = arith.index_cast %c7_i32 : i32 to index
    %c0_88 = arith.constant 0 : index
    %c0_89 = arith.constant 0 : index
    %404 = vector.load %arg4[%403, %c0_88, %c0_89] : memref<8x2x32xf32, #tpu.memory_space<vmem>>, vector<1x2x32xf32>
    %405 = vector.shape_cast %404 : vector<1x2x32xf32> to vector<2x32xf32>
    %406 = vector.shape_cast %402 : vector<2x32xf32> to vector<1x2x32xf32>
    tpu.vector_store %arg4[%403, %c0_88, %c0_89], %406 {strides = array<i32>} : memref<8x2x32xf32, #tpu.memory_space<vmem>>, vector<1x2x32xf32>,
    %407 = arith.addi %4, %c7_i32 : i32
    %c12_i32_90 = arith.constant 12 : i32
    %408 = arith.cmpi slt, %407, %c12_i32_90 : i32
    %409 = arith.extui %408 : i1 to i32
    %410 = arith.sitofp %409 : i32 to f32
    %411 = vector.broadcast %410 : f32 to vector<2x32xf32>
    %412 = arith.mulf %411, %402 : vector<2x32xf32>
    %cst_91 = arith.constant 1.000000e+00 : f32
    %413 = arith.subf %cst_91, %410 : f32
    %414 = vector.broadcast %413 : f32 to vector<2x32xf32>
    %415 = arith.mulf %414, %364 : vector<2x32xf32>
    %416 = arith.addf %412, %415 : vector<2x32xf32>
    %417 = vector.broadcast %410 : f32 to vector<2x32xf32>
    %418 = arith.mulf %417, %400 : vector<2x32xf32>
    %cst_92 = arith.constant 1.000000e+00 : f32
    %419 = arith.subf %cst_92, %410 : f32
    %420 = vector.broadcast %419 : f32 to vector<2x32xf32>
    %421 = arith.mulf %420, %370 : vector<2x32xf32>
    %422 = arith.addf %418, %421 : vector<2x32xf32>
    %c8_i32_93 = arith.constant 8 : i32
    %c0_94 = arith.constant 0 : index
    %c0_95 = arith.constant 0 : index
    %423 = vector.load %arg8[%c0_94, %c0_95] : memref<2x32xf32, #tpu.memory_space<vmem>>, vector<2x32xf32>
    tpu.vector_store %arg8[%c0_94, %c0_95], %416 {strides = array<i32>} : memref<2x32xf32, #tpu.memory_space<vmem>>, vector<2x32xf32>,
    %c0_96 = arith.constant 0 : index
    %c0_97 = arith.constant 0 : index
    %424 = vector.load %arg9[%c0_96, %c0_97] : memref<2x32xf32, #tpu.memory_space<vmem>>, vector<2x32xf32>
    tpu.vector_store %arg9[%c0_96, %c0_97], %422 {strides = array<i32>} : memref<2x32xf32, #tpu.memory_space<vmem>>, vector<2x32xf32>,
    %c1_i32_98 = arith.constant 1 : i32
    %425 = arith.cmpi eq, %arg1, %c1_i32_98 : i32
    %426 = arith.extui %425 : i1 to i32
    %c0_i32_99 = arith.constant 0 : i32
    %427 = arith.cmpi ne, %426, %c0_i32_99 : i32
    scf.if %427 {
      %c0_100 = arith.constant 0 : index
      %c0_101 = arith.constant 0 : index
      %428 = vector.load %arg5[%c0_100, %c0_101] : memref<2x32xf32, #tpu.memory_space<vmem>>, vector<2x32xf32>
      tpu.vector_store %arg5[%c0_100, %c0_101], %416 {strides = array<i32>} : memref<2x32xf32, #tpu.memory_space<vmem>>, vector<2x32xf32>,
      %c0_102 = arith.constant 0 : index
      %c0_103 = arith.constant 0 : index
      %429 = vector.load %arg6[%c0_102, %c0_103] : memref<2x32xf32, #tpu.memory_space<vmem>>, vector<2x32xf32>
      tpu.vector_store %arg6[%c0_102, %c0_103], %422 {strides = array<i32>} : memref<2x32xf32, #tpu.memory_space<vmem>>, vector<2x32xf32>,
    } else {
    }
    return
  }
  func.func @transform_0(%arg0: i32, %arg1: i32) -> (i32, i32, i32) {
    %c0_i32 = arith.constant 0 : i32
    %c0_i32_0 = arith.constant 0 : i32
    return %arg1, %arg0, %c0_i32 : i32, i32, i32
  }
  func.func @transform_2(%arg0: i32, %arg1: i32) -> (i32, i32, i32) {
    %c0_i32 = arith.constant 0 : i32
    %c0_i32_0 = arith.constant 0 : i32
    return %arg1, %arg0, %c0_i32 : i32, i32, i32
  }
  func.func @transform_3(%arg0: i32, %arg1: i32) -> (i32, i32) {
    %c0_i32 = arith.constant 0 : i32
    %c0_i32_0 = arith.constant 0 : i32
    return %arg0, %c0_i32 : i32, i32
  }
  func.func @transform_4(%arg0: i32, %arg1: i32) -> (i32, i32) {
    %c0_i32 = arith.constant 0 : i32
    %c0_i32_0 = arith.constant 0 : i32
    return %arg0, %c0_i32 : i32, i32
  }
}

</mosaic_0001>

<bundles_post_ra>
// kernel: weight_drop_lstm.1
= control target key start
LH: loop header
LB: loop body
LE: loop exit
PB: predicated region body
PF: predicated region fallthrough
CT: control target
= control target key end

     0   :  { %10 = vsyncpa [#allocation7], 0  ;;  %s1950_s0 = inlined_call_operand.vmem [shape: bf16[16,2,128], index: 0, kind: input, shape index: {}]   ;;  %s1951_s1 = inlined_call_operand.vmem [shape: bf16[32,128], index: 1, kind: input, shape index: {}]   ;;  %s1952_s2 = inlined_call_operand.vmem [shape: f32[16,2,32], index: 2, kind: output, shape index: {0}]   ;;  %s1953_s3 = inlined_call_operand.hbm [shape: f32[2,32], index: 3, kind: output, shape index: {1}]   ;;  %s1954_s4 = inlined_call_operand.hbm [shape: f32[2,32], index: 4, kind: output, shape index: {2}]  }
   0x1   :  { %11 = vsyncpa [#allocation9], 0  ;;  %s1661_s15 = smov 0   ;;  %s1663_s16 = smov 0  }
   0x2   :  { %s1665_s17 = smov 0  }
   0x3 LB: > { %s1296_s18 = sadd.s32 4294967295, %s1625_s17   ;;  %s26_s19 = sadd.s32 1, %s1621_s16  ;;  %s1625_s17 = sphi %s1665_s17, %s17_s17   ;;  %s1621_s16 = sphi %s1663_s16, %s1957_s16   ;;  %s1617_s15 = sphi %s1661_s15, %s1956_s15  }
   0x4   : > { %p27_p0 = scmp.ge.s32.totalorder %s26_s19, 2  ;;  %p1300_p1 = scmp.ge.s32.totalorder %s1625_s17, 1 }
   0x5   : > { %p164_p2 = scmp.lt.s32.totalorder %s1625_s17, 3 }
   0x6   : > { %s1959_s19 = smov (%p27_p0, %s26_s19), 0 }
   0x7   : > { %p165_p3 = pnand %p1300_p1, %p164_p2 }
   0x8   : > { %s1683_s20 = sshll.u32 (!%p165_p3), %s1617_s15, 3  ;;  %p1304_p5 = scmp.ne.s32.totalorder (!%p165_p3), %s1617_s15, 0 }
   0x9   : > { %168 = sbr.rel (%p165_p3) target bundleno = 5626 (0x15fa), region = 24  ;;  %p194_p4 = scmp.lt.s32.totalorder (!%p165_p3), %s1683_s20, 15 }
   0xe   : > { %s195_s21 = scalar_select %p194_p4, %s1683_s20, 15 }
   0xf   : > { %214 = sbr.rel (%p1304_p5) target bundleno = 26 (0x1a), region = 28 }
  0x10   : > { %s1690_s24 = scalar_lea.vmem %s1950_s0, %s195_s21  ;;  %s1303_s25 = sshll.u32 %s195_s21, 1 }
  0x11   : > { %s1695_s28 = scalar_lea.vmem %s1952_s2, %s1303_s25 }
  0x14   : > { %v248_v0 = vld [vmem:[%s1951_s1] sm:$0xff]  ;;  %v250_v1 = vld [vmem:[%s1951_s1 + $0x8] sm:$0xff] }
  0x15   : > { %249 = vst [vmem:[#allocation2] sm:$0xff] %v248_v0  ;;  %251 = vst [vmem:[#allocation2 + $0x8] sm:$0xff] %v250_v1 }
  0x16   : > { %259 = vsyncadd [#allocation5], 256 }
  0x17   : > { %1605 = dma.done.wait [#allocation5], 256 }
  0x18   : > { %1606 = vsyncadd [#allocation5], 4294967040  ;;  %vm264_vm0 = vcmask 254976   ;;  %v1627_v2 = vmov 0.0  }
  0x19   : > { %265 = vst.msk [vmem:[#allocation3] sm:$0x3] %vm264_vm0, %v1627_v2  ;;  %266 = vst.msk [vmem:[#allocation4] sm:$0x3] %vm264_vm0, %v1627_v2 }
  0x1a PF: > { %v1628_v4 = vmov 0.0   ;;  %vm1629_vm1 = vmmov 0   ;;  %vm289_vm2 = vcmask 261120   ;;  %v274_v8 = vld [vmem:[%s1690_s24] sm:$0x1]  ;;  %v345_v16 = vlaneseq  ;;  %s1631_s7 = smov 64  }
  0x1b   : > { %1370 = vmatprep.subr.bf16.mxu0 %v1628_v4  ;;  %1378 = vmatprep.subr.bf16.mxu1 %v1628_v4  ;;  %v275_v9 = vunpack.c.l.bf16 %v274_v8  ;;  %v1630_v14 = vmov 1983009808   ;;  %s1632_s8 = smov 32   ;;  %p382_p6 = scmp.lt.s32.totalorder %s1683_s20, 12  ;;  %v1310_v48 = vld [vmem:[%s1690_s24 + $0x1] sm:$0x1] }
  0x1c   : > { %v1704_v3 = vld [vmem:[#allocation2 + $0x8] sm:$0xff]   ;;  %v1709_v5 = vld [vmem:[#allocation2] sm:$0xff]   ;;  %1374 = vmatprep.mubr.msk.bf16.mxu0 %vm1629_vm1, %v1628_v4  ;;  %1382 = vmatprep.mubr.msk.bf16.mxu1 %vm1629_vm1, %v1628_v4  ;;  %v343_v15 = vunpack.c.l.s4 %v1630_v14  ;;  %v346_v19 = vshrl.u32 %v345_v16, 7  ;;  %s1633_s12 = smov 96   ;;  %v418_v49 = vunpack.c.l.bf16 %v1310_v48  ;;  %s504_s13 = sadd.s32 1, %s1683_s20  ;;  %vm380_vm3 = vcmask 254976  }
  0x1d   : > { %1371 = vmatpush3.bf16.msra.mxu0 %v1704_v3  ;;  %1379 = vmatpush3.bf16.msra.mxu1 %v1704_v3  ;;  %s383_s9 = scalar_select %p382_p6, 1, 0 }
  0x1e   : > { %1372 = vmatprep.subr.bf16.mxu0 %v1628_v4  ;;  %1380 = vmatprep.subr.bf16.mxu1 %v1628_v4  ;;  %v344_v18 = vunpack.c.0.s8 %v343_v15  ;;  %p505_p7 = scmp.lt.s32.totalorder %s504_s13, 12  ;;  %s605_s23 = sadd.s32 2, %s1683_s20 }
  0x1f   : > { %s384_s10 = scvt.s32.f32 %s383_s9  ;;  %p606_p8 = scmp.lt.s32.totalorder %s605_s23, 12 }
  0x20   : > { %v272_v6 = vld [vmem:[#allocation3] sm:$0x3]  ;;  %v1730_v20 = vsub.s32 %v344_v18, %v346_v19  ;;  %v273_v21 = vld [vmem:[#allocation4] sm:$0x3]  ;;  %s506_s14 = scalar_select %p505_p7, 1, 0 }
  0x21   : > { %v276_v7 = vpack.c.bf16 %v272_v6, %v272_v6  ;;  %1373 = vmatpush3.bf16.msra.mxu0 %v1709_v5  ;;  %1381 = vmatpush3.bf16.msra.mxu1 %v1709_v5  ;;  %s387_s11 = ssub.f32 1.0, %s384_s10  ;;  %v385_v40 = vstv %s384_s10  ;;  %s706_s29 = sadd.s32 3, %s1683_s20 }
  0x22   : > { %1386 = vmatprep.subr.bf16.mxu0 %v1628_v4  ;;  %1394 = vmatprep.subr.bf16.mxu1 %v1628_v4  ;;  %v348_v23 = vrot.slane %v273_v21, %v1730_v20  ;;  %s1758_s21 = scvt.s32.f32 %s506_s14  ;;  %p707_p9 = scmp.lt.s32.totalorder %s706_s29, 12 }
  0x23   : > { %v388_v30 = vstv %s387_s11  ;;  %s607_s25 = scalar_select %p606_p8, 1, 0 }
  0x24   : > { %1375 = vmatmul.mubr.msk.bf16.vlgmr.msra.gmra.mxu0 %vm289_vm2, %v276_v7  ;;  %v389_v31 = vmul.f32 %v388_v30, %v272_v6  ;;  %v403_v44 = vmul.f32 %v388_v30, %v273_v21  ;;  %s510_s22 = ssub.f32 1.0, %s1758_s21  ;;  %s807_s9 = sadd.s32 4, %s1683_s20 }
  0x25   : > { %1387 = vmatpush3.bf16.msra.mxu0 %v1704_v3  ;;  %1390 = vmatprep.mubr.msk.bf16.mxu0 %vm1629_vm1, %v1628_v4  ;;  %s1778_s26 = scvt.s32.f32 %s607_s25  ;;  %p808_p10 = scmp.lt.s32.totalorder %s807_s9, 12 }
  0x26   : > { %1388 = vmatprep.subr.bf16.mxu0 %v1628_v4  ;;  %v397_v32 = vrot.slane %v389_v31, %v1730_v20  ;;  %v411_v46 = vrot.slane %v403_v44, %v1730_v20  ;;  %v511_v8 = vstv %s510_s22  ;;  %s708_s30 = scalar_select %p707_p9, 1, 0 }
  0x27   : > { %s611_s27 = ssub.f32 1.0, %s1778_s26  ;;  %s908_s14 = sadd.s32 5, %s1683_s20 }
  0x28   : > { %s1798_s5 = scvt.s32.f32 %s708_s30  ;;  %p909_p11 = scmp.lt.s32.totalorder %s908_s14, 12 }
  0x29   : > { %1389 = vmatpush3.bf16.msra.mxu0 %v1709_v5  ;;  %s809_s10 = scalar_select %p808_p10, 1, 0 }
  0x2a   : > { %1402 = vmatprep.subr.bf16.mxu0 %v1628_v4  ;;  %s712_s6 = ssub.f32 1.0, %s1798_s5  ;;  %s1009_s25 = sadd.s32 6, %s1683_s20 }
  0x2b   : > { %s1817_s11 = scvt.s32.f32 %s809_s10  ;;  %p1010_p12 = scmp.lt.s32.totalorder %s1009_s25, 12 }
  0x2c   : > { %p1338_p0 = scmp.ne.s32.totalorder %s1617_s15, 1 }
  0x2d   : > { %s813_s13 = ssub.f32 1.0, %s1817_s11 }
  0xe4   : > { %v327_v10 = vpop.f32.mrf.mxu0 }
  0xe5   : > { %v333_v11 = vadd.f32 %v327_v10, %v275_v9 }
  0xe6   : > { %v1376_v12 = vpop.f32.mrf.mxu0 }
  0xe7   : > { %1481 = vtanh.f32 %v333_v11  ;;  %v1309_v24 = vmul.f32 -1.442695, %v333_v11  ;;  %v508_v11 = vstv %s1758_s21  ;;  %s910_s21 = scalar_select %p909_p11, 1, 0 }
  0xe8   : > { %v330_v13 = vpop.f32.mrf.mxu0 }
  0xe9   : > { %1483 = vpow2.f32 %v1309_v24  ;;  %s1836_s22 = scvt.s32.f32 %s910_s21 }
  0xea   : > { %v1377_v17 = vpop.f32.mrf.mxu0 }
  0xeb   : > { %v1314_v17 = vld [vmem:[%s1690_s24 + $0x2] sm:$0x1]  ;;  %s914_s23 = ssub.f32 1.0, %s1836_s22 }
  0xec   : > { %v519_v18 = vunpack.c.l.bf16 %v1314_v17 }
  0xf4   : > { %v1482_v22 = vpop.eup %1481 }
  0xf5   : > { %354 = vrot.lane.b32.xlu0 %v1482_v22, %s1631_s7 }
  0xf6   : > { %v1484_v25 = vpop.eup %1483 }
  0xf7   : > { %v337_v26 = vadd.f32 1.0, %v1484_v25 }
  0xf9   : > { %349 = vrot.lane.b32.xlu0 %v348_v23, %s1632_s8  ;;  %1485 = vrcp.f32 %v337_v26 }
  0xfd   : > { %398 = vrot.lane.b32.xlu0 %v397_v32, %s1633_s12 }
 0x106   : > { %v1486_v27 = vpop.eup %1485 }
 0x167   : > { %v355_v28 = vpop.permute.xlu0 %354 }
 0x168   : > { %v357_v29 = vmul.f32 %v1486_v27, %v355_v28 }
 0x16a   : > { %359 = vrot.lane.b32.xlu1 %v357_v29, %s1632_s8 }
 0x16b   : > { %v350_v33 = vpop.permute.xlu0 %349 }
 0x16c   : > { %v352_v34 = vmul.f32 %v1486_v27, %v350_v33 }
 0x16f   : > { %v399_v41 = vpop.permute.xlu0 %398 }
 0x1dc   : > { %v360_v35 = vpop.permute.xlu1 %359 }
 0x1dd   : > { %v362_v36 = vadd.f32 %v360_v35, %v352_v34 }
 0x1df   : > { %1487 = vtanh.f32 %v362_v36  ;;  %v402_v63 = vmul.f32 %v385_v40, %v362_v36 }
 0x1ec   : > { %v1488_v37 = vpop.eup %1487 }
 0x1ed   : > { %365 = vrot.lane.b32.xlu1 %v1488_v37, %s1631_s7 }
 0x25f   : > { %v366_v38 = vpop.permute.xlu1 %365 }
 0x260   : > { %v1740_v39 = vmul.f32 %v1486_v27, %v366_v38 }
 0x262   : > { %v386_v42 = vmul.f32 %v385_v40, %v1740_v39 }
 0x264   : > { %v401_v43 = vadd.f32 %v399_v41, %v386_v42  ;;  %v609_v42 = vstv %s1778_s26  ;;  %s1011_s26 = scalar_select %p1010_p12, 1, 0 }
 0x266   : > { %v419_v45 = vpack.c.bf16 %v401_v43, %v401_v43  ;;  %v512_v12 = vmul.f32 %v511_v8, %v401_v43  ;;  %v612_v43 = vstv %s611_s27  ;;  %s1850_s27 = scvt.s32.f32 %s1011_s26 }
 0x268   : > { %421 = vrot.lane.b32.xlu1 %v419_v45, %s1632_s8  ;;  %s1015_s29 = ssub.f32 1.0, %s1850_s27 }
 0x26c   : > { %412 = vrot.lane.b32.xlu1 %v411_v46, %s1632_s8 }
 0x2da   : > { %v422_v47 = vpop.permute.xlu1 %421 }
 0x2db   : > { %1383 = vmatmul.mubr.msk.bf16.vlgmr.msra.gmra.mxu1 %vm289_vm2, %v422_v47 }
 0x2dc   : > { %1395 = vmatpush3.bf16.msra.mxu1 %v1704_v3  ;;  %1398 = vmatprep.mubr.msk.bf16.mxu1 %vm1629_vm1, %v1628_v4 }
 0x2dd   : > { %1396 = vmatprep.subr.bf16.mxu1 %v1628_v4 }
 0x2de   : > { %v413_v62 = vpop.permute.xlu1 %412 }
 0x2df   : > { %v415_v0 = vadd.f32 %v413_v62, %v402_v63 }
 0x2e0   : > { %1397 = vmatpush3.bf16.msra.mxu1 %v1709_v5 }
 0x2e1   : > { %1410 = vmatprep.subr.bf16.mxu1 %v1628_v4  ;;  %v515_v33 = vmul.f32 %v511_v8, %v415_v0 }
 0x39b   : > { %v460_v50 = vpop.f32.mrf.mxu1 }
 0x39c   : > { %v466_v51 = vadd.f32 %v460_v50, %v418_v49  ;;  %v1318_v49 = vld [vmem:[%s1690_s24 + $0x3] sm:$0x1] }
 0x39d   : > { %v1384_v52 = vpop.f32.mrf.mxu1  ;;  %v620_v50 = vunpack.c.l.bf16 %v1318_v49 }
 0x39e   : > { %1489 = vtanh.f32 %v466_v51  ;;  %v1312_v56 = vmul.f32 -1.442695, %v466_v51 }
 0x39f   : > { %v463_v53 = vpop.f32.mrf.mxu1 }
 0x3a0   : > { %1491 = vpow2.f32 %v1312_v56 }
 0x3a1   : > { %v1385_v54 = vpop.f32.mrf.mxu1 }
 0x3ab   : > { %v1490_v55 = vpop.eup %1489 }
 0x3ac   : > { %476 = vrot.lane.b32.xlu0 %v1490_v55, %s1631_s7 }
 0x3ad   : > { %v1492_v57 = vpop.eup %1491 }
 0x3ae   : > { %v470_v58 = vadd.f32 1.0, %v1492_v57 }
 0x3b0   : > { %1493 = vrcp.f32 %v470_v58 }
 0x3bd   : > { %v1494_v59 = vpop.eup %1493 }
 0x3be   : > { %v474_v1 = vmul.f32 %v1494_v59, %v415_v0 }
 0x41e   : > { %v477_v60 = vpop.permute.xlu0 %476 }
 0x41f   : > { %v479_v61 = vmul.f32 %v1494_v59, %v477_v60 }
 0x421   : > { %481 = vrot.lane.b32.xlu0 %v479_v61, %s1632_s8 }
 0x493   : > { %v482_v2 = vpop.permute.xlu0 %481 }
 0x494   : > { %v484_v6 = vadd.f32 %v482_v2, %v474_v1 }
 0x496   : > { %1495 = vtanh.f32 %v484_v6  ;;  %v514_v32 = vmul.f32 %v508_v11, %v484_v6 }
 0x498   : > { %v516_v34 = vadd.f32 %v515_v33, %v514_v32 }
 0x49a   : > { %v616_v0 = vmul.f32 %v612_v43, %v516_v34 }
 0x4a3   : > { %v1496_v7 = vpop.eup %1495 }
 0x4a4   : > { %487 = vrot.lane.b32.xlu1 %v1496_v7, %s1631_s7 }
 0x516   : > { %v488_v9 = vpop.permute.xlu1 %487 }
 0x517   : > { %v1761_v10 = vmul.f32 %v1494_v59, %v488_v9 }
 0x519   : > { %v509_v13 = vmul.f32 %v508_v11, %v1761_v10 }
 0x51b   : > { %v513_v14 = vadd.f32 %v512_v12, %v509_v13  ;;  %v710_v12 = vstv %s1798_s5  ;;  %v713_v13 = vstv %s712_s6 }
 0x51d   : > { %v520_v15 = vpack.c.bf16 %v513_v14, %v513_v14  ;;  %v613_v44 = vmul.f32 %v612_v43, %v513_v14 }
 0x51f   : > { %522 = vrot.lane.b32.xlu0 %v520_v15, %s1632_s8 }
 0x591   : > { %v523_v16 = vpop.permute.xlu0 %522 }
 0x592   : > { %1391 = vmatmul.mubr.msk.bf16.vlgmr.msra.gmra.mxu0 %vm289_vm2, %v523_v16 }
 0x593   : > { %1403 = vmatpush3.bf16.msra.mxu0 %v1704_v3  ;;  %1406 = vmatprep.mubr.msk.bf16.mxu0 %vm1629_vm1, %v1628_v4 }
 0x594   : > { %1404 = vmatprep.subr.bf16.mxu0 %v1628_v4 }
 0x597   : > { %1405 = vmatpush3.bf16.msra.mxu0 %v1709_v5 }
 0x598   : > { %1418 = vmatprep.subr.bf16.mxu0 %v1628_v4 }
 0x652   : > { %v561_v19 = vpop.f32.mrf.mxu0 }
 0x653   : > { %v567_v21 = vadd.f32 %v561_v19, %v519_v18  ;;  %v1322_v19 = vld [vmem:[%s1690_s24 + $0x4] sm:$0x1] }
 0x654   : > { %v1392_v22 = vpop.f32.mrf.mxu0 }
 0x655   : > { %1497 = vtanh.f32 %v567_v21  ;;  %v1316_v26 = vmul.f32 -1.442695, %v567_v21  ;;  %v721_v21 = vunpack.c.l.bf16 %v1322_v19 }
 0x656   : > { %v564_v23 = vpop.f32.mrf.mxu0 }
 0x657   : > { %1499 = vpow2.f32 %v1316_v26 }
 0x658   : > { %v1393_v24 = vpop.f32.mrf.mxu0 }
 0x662   : > { %v1498_v25 = vpop.eup %1497 }
 0x663   : > { %577 = vrot.lane.b32.xlu1 %v1498_v25, %s1631_s7 }
 0x664   : > { %v1500_v27 = vpop.eup %1499 }
 0x665   : > { %v571_v28 = vadd.f32 1.0, %v1500_v27 }
 0x667   : > { %1501 = vrcp.f32 %v571_v28 }
 0x674   : > { %v1502_v29 = vpop.eup %1501 }
 0x675   : > { %v575_v35 = vmul.f32 %v1502_v29, %v516_v34 }
 0x6d5   : > { %v578_v30 = vpop.permute.xlu1 %577 }
 0x6d6   : > { %v580_v31 = vmul.f32 %v1502_v29, %v578_v30 }
 0x6d8   : > { %582 = vrot.lane.b32.xlu0 %v580_v31, %s1632_s8 }
 0x74a   : > { %v583_v36 = vpop.permute.xlu0 %582 }
 0x74b   : > { %v585_v37 = vadd.f32 %v583_v36, %v575_v35 }
 0x74d   : > { %1503 = vtanh.f32 %v585_v37  ;;  %v615_v63 = vmul.f32 %v609_v42, %v585_v37 }
 0x74f   : > { %v617_v1 = vadd.f32 %v616_v0, %v615_v63 }
 0x751   : > { %v717_v35 = vmul.f32 %v713_v13, %v617_v1 }
 0x75a   : > { %v1504_v38 = vpop.eup %1503 }
 0x75b   : > { %588 = vrot.lane.b32.xlu1 %v1504_v38, %s1631_s7 }
 0x7cd   : > { %v589_v40 = vpop.permute.xlu1 %588 }
 0x7ce   : > { %v1781_v41 = vmul.f32 %v1502_v29, %v589_v40 }
 0x7d0   : > { %v610_v45 = vmul.f32 %v609_v42, %v1781_v41 }
 0x7d2   : > { %v614_v46 = vadd.f32 %v613_v44, %v610_v45  ;;  %v811_v45 = vstv %s1817_s11 }
 0x7d4   : > { %v621_v47 = vpack.c.bf16 %v614_v46, %v614_v46  ;;  %v714_v14 = vmul.f32 %v713_v13, %v614_v46  ;;  %v814_v46 = vstv %s813_s13  ;;  %v912_v13 = vstv %s1836_s22 }
 0x7d6   : > { %623 = vrot.lane.b32.xlu0 %v621_v47, %s1632_s8 }
 0x848   : > { %v624_v48 = vpop.permute.xlu0 %623 }
 0x849   : > { %1399 = vmatmul.mubr.msk.bf16.vlgmr.msra.gmra.mxu1 %vm289_vm2, %v624_v48 }
 0x84a   : > { %1411 = vmatpush3.bf16.msra.mxu1 %v1704_v3  ;;  %1414 = vmatprep.mubr.msk.bf16.mxu1 %vm1629_vm1, %v1628_v4 }
 0x84b   : > { %1412 = vmatprep.subr.bf16.mxu1 %v1628_v4 }
 0x84e   : > { %1413 = vmatpush3.bf16.msra.mxu1 %v1709_v5 }
 0x84f   : > { %1426 = vmatprep.subr.bf16.mxu1 %v1628_v4 }
 0x909   : > { %v662_v51 = vpop.f32.mrf.mxu1 }
 0x90a   : > { %v668_v52 = vadd.f32 %v662_v51, %v620_v50 }
 0x90b   : > { %v1400_v53 = vpop.f32.mrf.mxu1 }
 0x90c   : > { %1505 = vtanh.f32 %v668_v52  ;;  %v1320_v57 = vmul.f32 -1.442695, %v668_v52  ;;  %v1326_v52 = vld [vmem:[%s1690_s24 + $0x5] sm:$0x1] }
 0x90d   : > { %v665_v54 = vpop.f32.mrf.mxu1  ;;  %v822_v53 = vunpack.c.l.bf16 %v1326_v52 }
 0x90e   : > { %1507 = vpow2.f32 %v1320_v57 }
 0x90f   : > { %v1401_v55 = vpop.f32.mrf.mxu1 }
 0x919   : > { %v1506_v56 = vpop.eup %1505 }
 0x91a   : > { %678 = vrot.lane.b32.xlu1 %v1506_v56, %s1631_s7 }
 0x91b   : > { %v1508_v58 = vpop.eup %1507 }
 0x91c   : > { %v672_v59 = vadd.f32 1.0, %v1508_v58 }
 0x91e   : > { %1509 = vrcp.f32 %v672_v59 }
 0x92b   : > { %v1510_v60 = vpop.eup %1509 }
 0x92c   : > { %v676_v2 = vmul.f32 %v1510_v60, %v617_v1 }
 0x98c   : > { %v679_v61 = vpop.permute.xlu1 %678 }
 0x98d   : > { %v681_v62 = vmul.f32 %v1510_v60, %v679_v61 }
 0x98f   : > { %683 = vrot.lane.b32.xlu0 %v681_v62, %s1632_s8 }
 0xa01   : > { %v684_v6 = vpop.permute.xlu0 %683 }
 0xa02   : > { %v686_v7 = vadd.f32 %v684_v6, %v676_v2 }
 0xa04   : > { %1511 = vtanh.f32 %v686_v7  ;;  %v716_v34 = vmul.f32 %v710_v12, %v686_v7 }
 0xa06   : > { %v718_v36 = vadd.f32 %v717_v35, %v716_v34 }
 0xa08   : > { %v818_v0 = vmul.f32 %v814_v46, %v718_v36 }
 0xa11   : > { %v1512_v8 = vpop.eup %1511 }
 0xa12   : > { %689 = vrot.lane.b32.xlu1 %v1512_v8, %s1631_s7 }
 0xa84   : > { %v690_v9 = vpop.permute.xlu1 %689 }
 0xa85   : > { %v1801_v11 = vmul.f32 %v1510_v60, %v690_v9 }
 0xa87   : > { %v711_v15 = vmul.f32 %v710_v12, %v1801_v11 }
 0xa89   : > { %v715_v16 = vadd.f32 %v714_v14, %v711_v15  ;;  %v915_v14 = vstv %s914_s23 }
 0xa8b   : > { %v722_v17 = vpack.c.bf16 %v715_v16, %v715_v16  ;;  %v815_v47 = vmul.f32 %v814_v46, %v715_v16 }
 0xa8d   : > { %724 = vrot.lane.b32.xlu0 %v722_v17, %s1632_s8 }
 0xaff   : > { %v725_v18 = vpop.permute.xlu0 %724 }
 0xb00   : > { %1407 = vmatmul.mubr.msk.bf16.vlgmr.msra.gmra.mxu0 %vm289_vm2, %v725_v18 }
 0xb01   : > { %1419 = vmatpush3.bf16.msra.mxu0 %v1704_v3  ;;  %1422 = vmatprep.mubr.msk.bf16.mxu0 %vm1629_vm1, %v1628_v4 }
 0xb02   : > { %1420 = vmatprep.subr.bf16.mxu0 %v1628_v4 }
 0xb05   : > { %1421 = vmatpush3.bf16.msra.mxu0 %v1709_v5 }
 0xbc0   : > { %v763_v22 = vpop.f32.mrf.mxu0 }
 0xbc1   : > { %v769_v23 = vadd.f32 %v763_v22, %v721_v21  ;;  %v1330_v21 = vld [vmem:[%s1690_s24 + $0x6] sm:$0x1] }
 0xbc2   : > { %v1408_v24 = vpop.f32.mrf.mxu0  ;;  %v923_v22 = vunpack.c.l.bf16 %v1330_v21  ;;  %v700_v21 = vrot.slane %v1801_v11, %v1730_v20 }
 0xbc3   : > { %1513 = vtanh.f32 %v769_v23  ;;  %v1324_v28 = vmul.f32 -1.442695, %v769_v23 }
 0xbc4   : > { %v766_v25 = vpop.f32.mrf.mxu0 }
 0xbc5   : > { %1515 = vpow2.f32 %v1324_v28 }
 0xbc6   : > { %v1409_v26 = vpop.f32.mrf.mxu0 }
 0xbd0   : > { %v1514_v27 = vpop.eup %1513 }
 0xbd1   : > { %779 = vrot.lane.b32.xlu1 %v1514_v27, %s1631_s7 }
 0xbd2   : > { %v1516_v29 = vpop.eup %1515 }
 0xbd3   : > { %v773_v30 = vadd.f32 1.0, %v1516_v29 }
 0xbd5   : > { %1517 = vrcp.f32 %v773_v30 }
 0xbe2   : > { %v1518_v31 = vpop.eup %1517 }
 0xbe3   : > { %v777_v37 = vmul.f32 %v1518_v31, %v718_v36 }
 0xc43   : > { %v780_v32 = vpop.permute.xlu1 %779 }
 0xc44   : > { %v782_v33 = vmul.f32 %v1518_v31, %v780_v32 }
 0xc46   : > { %784 = vrot.lane.b32.xlu0 %v782_v33, %s1632_s8 }
 0xcb8   : > { %v785_v38 = vpop.permute.xlu0 %784 }
 0xcb9   : > { %v787_v40 = vadd.f32 %v785_v38, %v777_v37 }
 0xcbb   : > { %1519 = vtanh.f32 %v787_v40  ;;  %v817_v63 = vmul.f32 %v811_v45, %v787_v40 }
 0xcbd   : > { %v819_v1 = vadd.f32 %v818_v0, %v817_v63 }
 0xcbf   : > { %v919_v36 = vmul.f32 %v915_v14, %v819_v1 }
 0xcc8   : > { %v1520_v42 = vpop.eup %1519 }
 0xcc9   : > { %790 = vrot.lane.b32.xlu1 %v1520_v42, %s1631_s7 }
 0xd3b   : > { %v791_v43 = vpop.permute.xlu1 %790 }
 0xd3c   : > { %v1820_v44 = vmul.f32 %v1518_v31, %v791_v43 }
 0xd3e   : > { %v812_v48 = vmul.f32 %v811_v45, %v1820_v44 }
 0xd40   : > { %v816_v49 = vadd.f32 %v815_v47, %v812_v48  ;;  %v1013_v47 = vstv %s1850_s27  ;;  %v1016_v48 = vstv %s1015_s29 }
 0xd42   : > { %v823_v50 = vpack.c.bf16 %v816_v49, %v816_v49  ;;  %v916_v15 = vmul.f32 %v915_v14, %v816_v49 }
 0xd44   : > { %825 = vrot.lane.b32.xlu0 %v823_v50, %s1632_s8 }
 0xdb6   : > { %v826_v51 = vpop.permute.xlu0 %825 }
 0xdb7   : > { %1415 = vmatmul.mubr.msk.bf16.vlgmr.msra.gmra.mxu1 %vm289_vm2, %v826_v51 }
 0xdb8   : > { %1427 = vmatpush3.bf16.msra.mxu1 %v1704_v3  ;;  %1430 = vmatprep.mubr.msk.bf16.mxu1 %vm1629_vm1, %v1628_v4 }
 0xdb9   : > { %1428 = vmatprep.subr.bf16.mxu1 %v1628_v4 }
 0xdbc   : > { %1429 = vmatpush3.bf16.msra.mxu1 %v1709_v5 }
 0xe77   : > { %v864_v54 = vpop.f32.mrf.mxu1 }
 0xe78   : > { %v870_v55 = vadd.f32 %v864_v54, %v822_v53  ;;  %v1334_v54 = vld [vmem:[%s1690_s24 + $0x7] sm:$0x1]  ;;  %s1110_s24 = sadd.s32 7, %s1683_s20 }
 0xe79   : > { %v1416_v56 = vpop.f32.mrf.mxu1  ;;  %p1111_p13 = scmp.lt.s32.totalorder %s1110_s24, 12 }
 0xe7a   : > { %1521 = vtanh.f32 %v870_v55  ;;  %v1328_v60 = vmul.f32 -1.442695, %v870_v55  ;;  %v1024_v55 = vunpack.c.l.bf16 %v1334_v54 }
 0xe7b   : > { %v867_v57 = vpop.f32.mrf.mxu1  ;;  %s1112_s30 = scalar_select %p1111_p13, 1, 0 }
 0xe7c   : > { %1523 = vpow2.f32 %v1328_v60 }
 0xe7d   : > { %v1417_v58 = vpop.f32.mrf.mxu1 }
 0xe87   : > { %v1522_v59 = vpop.eup %1521 }
 0xe88   : > { %880 = vrot.lane.b32.xlu1 %v1522_v59, %s1631_s7 }
 0xe89   : > { %v1524_v3 = vpop.eup %1523 }
 0xe8a   : > { %v874_v61 = vadd.f32 1.0, %v1524_v3 }
 0xe8c   : > { %1525 = vrcp.f32 %v874_v61 }
 0xe99   : > { %v1526_v4 = vpop.eup %1525 }
 0xe9a   : > { %v878_v2 = vmul.f32 %v1526_v4, %v819_v1  ;;  %v376_v1 = vrot.slane %v1740_v39, %v1730_v20 }
 0xefa   : > { %v881_v62 = vpop.permute.xlu1 %880 }
 0xefb   : > { %v883_v5 = vmul.f32 %v1526_v4, %v881_v62 }
 0xefd   : > { %885 = vrot.lane.b32.xlu0 %v883_v5, %s1632_s8 }
 0xf6f   : > { %v886_v6 = vpop.permute.xlu0 %885 }
 0xf70   : > { %v888_v7 = vadd.f32 %v886_v6, %v878_v2  ;;  %v599_v2 = vrot.slane %v1781_v41, %v1730_v20  ;;  %v801_v6 = vrot.slane %v1820_v44, %v1730_v20 }
 0xf72   : > { %1527 = vtanh.f32 %v888_v7  ;;  %v918_v35 = vmul.f32 %v912_v13, %v888_v7 }
 0xf74   : > { %v920_v37 = vadd.f32 %v919_v36, %v918_v35 }
 0xf7f   : > { %v1528_v8 = vpop.eup %1527 }
 0xf80   : > { %891 = vrot.lane.b32.xlu1 %v1528_v8, %s1631_s7  ;;  %v1020_v8 = vmul.f32 %v1016_v48, %v920_v37 }
 0xff2   : > { %v892_v9 = vpop.permute.xlu1 %891 }
 0xff3   : > { %v1839_v12 = vmul.f32 %v1526_v4, %v892_v9 }
 0xff5   : > { %v913_v16 = vmul.f32 %v912_v13, %v1839_v12 }
 0xff7   : > { %v917_v17 = vadd.f32 %v916_v15, %v913_v16 }
 0xff9   : > { %v924_v18 = vpack.c.bf16 %v917_v17, %v917_v17  ;;  %v1017_v49 = vmul.f32 %v1016_v48, %v917_v17 }
 0xffb   : > { %926 = vrot.lane.b32.xlu0 %v924_v18, %s1632_s8 }
0x106d   : > { %v927_v19 = vpop.permute.xlu0 %926 }
0x106e   : > { %1423 = vmatmul.mubr.msk.bf16.vlgmr.msra.gmra.mxu0 %vm289_vm2, %v927_v19  ;;  %v498_v19 = vrot.slane %v1761_v10, %v1730_v20 }
0x112e   : > { %v965_v23 = vpop.f32.mrf.mxu0 }
0x112f   : > { %v971_v24 = vadd.f32 %v965_v23, %v923_v22  ;;  %v902_v22 = vrot.slane %v1839_v12, %v1730_v20 }
0x1130   : > { %v1424_v25 = vpop.f32.mrf.mxu0 }
0x1131   : > { %1529 = vtanh.f32 %v971_v24  ;;  %v1332_v29 = vmul.f32 -1.442695, %v971_v24 }
0x1132   : > { %v968_v26 = vpop.f32.mrf.mxu0 }
0x1133   : > { %1531 = vpow2.f32 %v1332_v29 }
0x1134   : > { %v1425_v27 = vpop.f32.mrf.mxu0 }
0x113e   : > { %v1530_v28 = vpop.eup %1529 }
0x113f   : > { %981 = vrot.lane.b32.xlu1 %v1530_v28, %s1631_s7 }
0x1140   : > { %v1532_v30 = vpop.eup %1531 }
0x1141   : > { %v975_v31 = vadd.f32 1.0, %v1532_v30 }
0x1143   : > { %1533 = vrcp.f32 %v975_v31 }
0x1150   : > { %v1534_v32 = vpop.eup %1533 }
0x1151   : > { %v979_v38 = vmul.f32 %v1534_v32, %v920_v37 }
0x11b1   : > { %v982_v33 = vpop.permute.xlu1 %981 }
0x11b2   : > { %v984_v34 = vmul.f32 %v1534_v32, %v982_v33 }
0x11b4   : > { %986 = vrot.lane.b32.xlu0 %v984_v34, %s1632_s8 }
0x1226   : > { %v987_v40 = vpop.permute.xlu0 %986 }
0x1227   : > { %v989_v42 = vadd.f32 %v987_v40, %v979_v38 }
0x1229   : > { %1535 = vtanh.f32 %v989_v42  ;;  %v1019_v39 = vmul.f32 %v1013_v47, %v989_v42 }
0x122b   : > { %v1021_v9 = vadd.f32 %v1020_v8, %v1019_v39 }
0x1236   : > { %v1536_v43 = vpop.eup %1535 }
0x1237   : > { %992 = vrot.lane.b32.xlu1 %v1536_v43, %s1631_s7 }
0x12a9   : > { %v993_v45 = vpop.permute.xlu1 %992 }
0x12aa   : > { %v995_v46 = vmul.f32 %v1534_v32, %v993_v45 }
0x12ac   : > { %v1014_v50 = vmul.f32 %v1013_v47, %v995_v46  ;;  %v1003_v7 = vrot.slane %v995_v46, %v1730_v20 }
0x12ae   : > { %v1854_v51 = vadd.f32 %v1017_v49, %v1014_v50 }
0x12b0   : > { %v1025_v52 = vpack.c.bf16 %v1854_v51, %v1854_v51 }
0x12b2   : > { %1027 = vrot.lane.b32.xlu0 %v1025_v52, %s1632_s8 }
0x1324   : > { %v1028_v53 = vpop.permute.xlu0 %1027 }
0x1325   : > { %1431 = vmatmul.mubr.msk.bf16.vlgmr.msra.gmra.mxu1 %vm289_vm2, %v1028_v53 }
0x13e5   : > { %v1066_v56 = vpop.f32.mrf.mxu1 }
0x13e6   : > { %v1072_v57 = vadd.f32 %v1066_v56, %v1024_v55 }
0x13e7   : > { %v1432_v58 = vpop.f32.mrf.mxu1 }
0x13e8   : > { %1537 = vtanh.f32 %v1072_v57  ;;  %v1336_v61 = vmul.f32 -1.442695, %v1072_v57 }
0x13e9   : > { %v1069_v59 = vpop.f32.mrf.mxu1 }
0x13ea   : > { %1539 = vpow2.f32 %v1336_v61 }
0x13eb   : > { %v1433_v60 = vpop.f32.mrf.mxu1 }
0x13f5   : > { %v1538_v3 = vpop.eup %1537 }
0x13f6   : > { %1082 = vrot.lane.b32.xlu1 %v1538_v3, %s1631_s7 }
0x13f7   : > { %v1540_v4 = vpop.eup %1539 }
0x13f8   : > { %v1076_v62 = vadd.f32 1.0, %v1540_v4 }
0x13fa   : > { %1541 = vrcp.f32 %v1076_v62 }
0x1407   : > { %v1542_v5 = vpop.eup %1541 }
0x1408   : > { %v1080_v13 = vmul.f32 %v1542_v5, %v1021_v9 }
0x1468   : > { %v1083_v63 = vpop.permute.xlu1 %1082 }
0x1469   : > { %v1085_v0 = vmul.f32 %v1542_v5, %v1083_v63 }
0x146b   : > { %1087 = vrot.lane.b32.xlu0 %v1085_v0, %s1632_s8 }
0x146f   : > { %377 = vrot.lane.b32.xlu0 %v376_v1, %s1632_s8 }
0x1473   : > { %600 = vrot.lane.b32.xlu0 %v599_v2, %s1632_s8 }
0x1477   : > { %802 = vrot.lane.b32.xlu0 %v801_v6, %s1632_s8 }
0x147b   : > { %1004 = vrot.lane.b32.xlu0 %v1003_v7, %s1632_s8 }
0x14dd   : > { %v1088_v14 = vpop.permute.xlu0 %1087 }
0x14de   : > { %v1090_v41 = vadd.f32 %v1088_v14, %v1080_v13 }
0x14e0   : > { %1543 = vtanh.f32 %v1090_v41 }
0x14e1   : > { %v378_v15 = vpop.permute.xlu0 %377 }
0x14e2   : > { %381 = vst.msk [vmem:[%s1695_s28] sm:$0x3] %vm380_vm3, %v378_v15 }
0x14e5   : > { %v601_v44 = vpop.permute.xlu0 %600 }
0x14e6   : > { %1317 = vst.msk [vmem:[%s1695_s28 + $0x4] sm:$0x3] %vm380_vm3, %v601_v44 }
0x14e9   : > { %v803_v16 = vpop.permute.xlu0 %802 }
0x14ea   : > { %1325 = vst.msk [vmem:[%s1695_s28 + $0x8] sm:$0x3] %vm380_vm3, %v803_v16 }
0x14ed   : > { %v1544_v17 = vpop.eup %1543  ;;  %v1005_v18 = vpop.permute.xlu0 %1004 }
0x14ee   : > { %1333 = vst.msk [vmem:[%s1695_s28 + $0xc] sm:$0x3] %vm380_vm3, %v1005_v18  ;;  %1093 = vrot.lane.b32.xlu1 %v1544_v17, %s1631_s7  ;;  %s1113_s7 = scvt.s32.f32 %s1112_s30 }
0x14f0   : > { %s1116_s5 = ssub.f32 1.0, %s1113_s7  ;;  %v1114_v23 = vstv %s1113_s7 }
0x14f1   : > { %v1120_v24 = vmul.f32 %v1114_v23, %v1090_v41 }
0x14f2   : > { %499 = vrot.lane.b32.xlu1 %v498_v19, %s1632_s8  ;;  %v1117_v10 = vstv %s1116_s5 }
0x14f3   : > { %v1121_v26 = vmul.f32 %v1117_v10, %v1021_v9  ;;  %v1118_v28 = vmul.f32 %v1117_v10, %v1854_v51 }
0x14f5   : > { %v1122_v27 = vadd.f32 %v1121_v26, %v1120_v24 }
0x14f6   : > { %701 = vrot.lane.b32.xlu1 %v700_v21, %s1632_s8 }
0x14f7   : > { %v1142_v32 = vrot.slane %v1122_v27, %v1730_v20 }
0x14fa   : > { %903 = vrot.lane.b32.xlu1 %v902_v22, %s1632_s8 }
0x1560   : > { %v1094_v25 = vpop.permute.xlu1 %1093 }
0x1561   : > { %v1096_v11 = vmul.f32 %v1542_v5, %v1094_v25 }
0x1563   : > { %v1104_v12 = vrot.slane %v1096_v11, %v1730_v20  ;;  %v1115_v29 = vmul.f32 %v1114_v23, %v1096_v11 }
0x1564   : > { %v500_v30 = vpop.permute.xlu1 %499 }
0x1565   : > { %v1119_v31 = vadd.f32 %v1118_v28, %v1115_v29  ;;  %1313 = vst.msk [vmem:[%s1695_s28 + $0x2] sm:$0x3] %vm380_vm3, %v500_v30  ;;  %1105 = vrot.lane.b32.xlu1 %v1104_v12, %s1632_s8 }
0x1567   : > { %v1130_v33 = vrot.slane %v1119_v31, %v1730_v20 }
0x1568   : > { %v702_v34 = vpop.permute.xlu1 %701 }
0x1569   : > { %1321 = vst.msk [vmem:[%s1695_s28 + $0x6] sm:$0x3] %vm380_vm3, %v702_v34  ;;  %1143 = vrot.lane.b32.xlu1 %v1142_v32, %s1633_s12  ;;  %1131 = vrot.lane.b32.xlu0 %v1130_v33, %s1632_s8 }
0x156c   : > { %v904_v35 = vpop.permute.xlu1 %903 }
0x156d   : > { %1329 = vst.msk [vmem:[%s1695_s28 + $0xa] sm:$0x3] %vm380_vm3, %v904_v35 }
0x15d7   : > { %v1106_v36 = vpop.permute.xlu1 %1105 }
0x15d8   : > { %1337 = vst.msk [vmem:[%s1695_s28 + $0xe] sm:$0x3] %vm380_vm3, %v1106_v36  ;;  %1150 = sbr.rel (%p1338_p0) target bundleno = 5598 (0x15de), region = 66 }
0x15db   : > { %v1144_v37 = vpop.permute.xlu1 %1143  ;;  %v1132_v38 = vpop.permute.xlu0 %1131 }
0x15dc   : > { %1146 = vst.msk [vmem:[#allocation4] sm:$0x3] %vm380_vm3, %v1144_v37  ;;  %1134 = vst.msk [vmem:[#allocation3] sm:$0x3] %vm380_vm3, %v1132_v38 }
0x15dd   : > { %1151 = vst.msk [vmem:[#allocation6] sm:$0x3] %vm380_vm3, %v1132_v38  ;;  %1152 = vst.msk [vmem:[#allocation8] sm:$0x3] %vm380_vm3, %v1144_v37 }
0x15de PF: > { %p1915_p1 = scmp.eq.s32.totalorder %s1296_s18, 1  ;;  %s1634_s28 = smov [#allocation6]  }
0x15df   : > { %s1174_s8 = sshll.u32 %s1634_s28, 4  ;;  %s1635_s12 = smov [#allocation8]   ;;  %s1175_s8 = int_to_ptr.vmem [resolvable:$true] %s1174_s8 }
0x15e0   : > { %s1187_s6 = sshll.u32 %s1635_s12, 4  ;;  %s1545_s15 = scalar_lea.vmem %s1175_s8, 32  ;;  %s1188_s6 = int_to_ptr.vmem [resolvable:$true] %s1187_s6 }
0x15e1   : > { %p1546_p2 = scmp.ne.s32.totalorder %s1175_s8, %s1545_s15  ;;  %p1552_p5 = scmp.lt.s32.totalorder %s1175_s8, %s1175_s8 }
0x15e2   : > { %p1553_p6 = scmp.lt.s32.totalorder %s1545_s15, %s1545_s15 }
0x15e3   : > { %p1547_p3 = pnand %p1546_p2, %p1915_p1 }
0x15e4   : > { %p1554_p7 = por %p1553_p6, %p1552_p5 }
0x15e5   : > { %p1548_p4 = pneg %p1547_p3 }
0x15e7   : > { %p1555_p8 = pnand %p1554_p7, %p1548_p4 }
0x15e9   : > { %1558 = shalt.err (!%p1555_p8)
}
0x15ea   : > { %1435 = dma.vmem_to_hbm [thread:$0]  (%p1915_p1), %s1175_s8, 32, %s1953_s3, [#allocation7]  }
0x15eb   : > { %s1569_s10 = scalar_lea.vmem %s1188_s6, 32  ;;  %p1576_p12 = scmp.lt.s32.totalorder %s1188_s6, %s1188_s6 }
0x15ec   : > { %p1570_p9 = scmp.ne.s32.totalorder %s1188_s6, %s1569_s10  ;;  %p1577_p13 = scmp.lt.s32.totalorder %s1569_s10, %s1569_s10 }
0x15ee   : > { %p1571_p10 = pnand %p1570_p9, %p1915_p1  ;;  %p1578_p0 = por %p1577_p13, %p1576_p12 }
0x15f0   : > { %p1572_p11 = pneg %p1571_p10 }
0x15f2   : > { %p1579_p2 = pnand %p1578_p0, %p1572_p11 }
0x15f4   : > { %1582 = shalt.err (!%p1579_p2)
}
0x15f5   : > { %1437 = dma.vmem_to_hbm [thread:$0]  (%p1915_p1), %s1188_s6, 32, %s1954_s4, [#allocation9]  }
0x15f6   : > { %1608 = dma.done.wait (%p1915_p1), [#allocation7], 32  }
0x15f7   : > { %1610 = vsyncadd (%p1915_p1), [#allocation7], 4294967264 }
0x15f8   : > { %1612 = dma.done.wait (%p1915_p1), [#allocation9], 32  }
0x15f9   : > { %1614 = vsyncadd (%p1915_p1), [#allocation9], 4294967264 }
0x15fa PF: > { %s17_s17 = sadd.s32 1, %s1625_s17   ;;  %s1956_s15 = smov %s1621_s16 }
0x15fb   : > { %p14_p3 = scmp.ge.s32.totalorder %s17_s17, 4   ;;  %s1957_s16 = smov %s1959_s19 }
0x15fd   :  { %16 = sbr.rel (!%p14_p3) target bundleno = 3 (0x3), region = 137 }
0x1602   :  { %1215 = vsyncpa [#allocation7], 1 }
0x1603   :  { %1217 = vsyncpa [#allocation7 + $0x1], 1 }
0x1604   :  { %1218 = vsyncpa [#allocation9], 1 }
0x1605   :  { %1219 = vsyncmov [#allocation5] }
0x1608   :  { %s1220_s14 = vpop.sfrf %1219 }
0x1609   :  { %p1345_p4 = scmp.ne.s32.totalorder %s1220_s14, 0 }
0x160b   :  { %1224 = shalt.err (%p1345_p4)  }

</bundles_post_ra>
